<compile_context>
chip_gen: v5e
topology: v5e:2x2
jax: 0.10.0
libtpu: 0.0.40
codegen_flags: <defaults>
</compile_context>

<pallas_src>
import math
import functools

import jax
import jax.numpy as jnp
from jax import lax
from jax.experimental import pallas as pl
from jax.experimental.pallas import tpu as pltpu

D_MODEL = 32
NHEAD = 4
N_STREAMS = 3            # carbs / bolus / basal
EPS = 1e-5               # nn.LayerNorm default eps
LAYER_SCALE_INIT = 1e-4
NEG_INF = -1e9           # additive mask for cross-batch (query, key) pairs


# ----------------------------- in-kernel helpers -----------------------------

def _layer_norm(x, w, b):
    mu = jnp.mean(x, axis=-1, keepdims=True)
    xc = x - mu
    var = jnp.mean(xc * xc, axis=-1, keepdims=True)
    return xc * lax.rsqrt(var + EPS) * w + b


def _gelu_exact(x):
    # nn.GELU() default = exact erf formulation.
    # TODO(synk): on v5e, if the bundle dump shows VALU saturated, switch to the
    # tanh form (rides the EUP); its ~1e-3 error is damped by layer-scale 1e-4.
    return 0.5 * x * (1.0 + lax.erf(x / math.sqrt(2.0)))


# --------------------------------- the kernel --------------------------------

def layer_kernel(g_ref, c_ref, bo_ref, ba_ref,
                 attn_w, attn_b, bk_col,
                 gate_w, gate_b, gate_bcast,
                 ff_w1, ff_b1, ff_w2, ff_b2,
                 norm_w, norm_b, ls_ref,
                 mask_s, mask_c, kmask_s, kmask_c, vmask_s, vmask_c,
                 seg_sum_s, seg_bcast_s, seg_sum_c, seg_bcast_c,
                 out_ref, *, nhead, batch, seq):
    H = nhead
    B, S = batch, seq
    D = g_ref.shape[-1]
    N = B * S

    dot = functools.partial(jnp.dot, preferred_element_type=jnp.float32)

    x = g_ref[...].reshape(N, D)
    nw = norm_w[...]
    nb = norm_b[...]
    ls = ls_ref[...]

    def flat_mha(q_in, kv_in, wq, bq, wk, bk, wv, bv,
                 mask, kmask, vmask, seg_sum, seg_bcast, p_scale=None):
        """Multi-head attention with heads (x streams) flattened into lanes.

        Every step is a lane-dense 2-D matmul (>=32-lane outputs):
          q      (Nq, D)      = q_in @ wq + bq           (1/sqrt(Dh) pre-folded)
          kt     (D, Nkv)     = wk @ kv_in^T + bk        (K produced transposed)
          kexp   (D, H*Nkv)   = [kt kt .. kt] * head-block mask
          s      (Nq, H*Nkv)  = q @ kexp + batch mask
          softmax per 0/1 segment via two tiny 0/1 matmuls (seg_sum / seg_bcast)
          vexp   (H*Nkv, D)   = [v; v; ..; v] * head-block mask
          out    (Nq, D)      = P @ vexp    (heads concatenated in lanes)
        The lane/sublane replication of kt/v replaces 2*H narrow per-head MXU
        pushes (plus their relayouts) with a couple of vector copies.
        """
        q = dot(q_in, wq) + bq
        kt = jnp.einsum('ed,nd->en', wk, kv_in,
                        preferred_element_type=jnp.float32) + bk
        v = dot(kv_in, wv) + bv
        kexp = jnp.concatenate([kt] * H, axis=1) * kmask
        vexp = jnp.concatenate([v] * H, axis=0) * vmask
        s = dot(q, kexp) + mask
        e = jnp.exp(s - jnp.max(s, axis=-1, keepdims=True))
        denom = dot(e, seg_sum)                 # per-(head[,stream]) sums
        p = e * dot(pl.reciprocal(denom, approx=True), seg_bcast)
        if p_scale is not None:
            p = p * p_scale                     # per-stream sigmoid gates
        return dot(p, vexp)

    # ---------------- block 1: self attention ----------------
    xn = _layer_norm(x, nw[0], nb[0])
    av_s = flat_mha(xn, xn,
                    attn_w[0], attn_b[0], attn_w[1], bk_col[0],
                    attn_w[2], attn_b[1],
                    mask_s[...], kmask_s[...], vmask_s[...],
                    seg_sum_s[...], seg_bcast_s[...])
    x1 = x + ls[0] * (dot(av_s, attn_w[3]) + attn_b[2])

    # ------ block 2: fused 3-stream cross attention + sigmoid gating ------
    qn = _layer_norm(x1, nw[1], nb[1])
    kv_all = jnp.concatenate([c_ref[...].reshape(N, D),
                              bo_ref[...].reshape(N, D),
                              ba_ref[...].reshape(N, D)], axis=0)   # (3N, D)
    g3 = jax.nn.sigmoid(dot(qn, gate_w[...]) + gate_b[...])         # (N, 3)
    g_rep = dot(g3, gate_bcast[...])     # (N, H*3N): gate of each lane's stream
    av_c = flat_mha(qn, kv_all,
                    attn_w[4], attn_b[3], attn_w[5], bk_col[1],
                    attn_w[6], attn_b[4],
                    mask_c[...], kmask_c[...], vmask_c[...],
                    seg_sum_c[...], seg_bcast_c[...], p_scale=g_rep)
    gsum = jnp.sum(g3, axis=-1, keepdims=True)                      # (N, 1)
    fused = dot(av_c, attn_w[7]) + gsum * attn_b[5]
    x2 = x1 + ls[1] * fused              # ls[1] already carries the 1/3

    # ---------------- block 3: feed forward ----------------
    yn = _layer_norm(x2, nw[2], nb[2])
    h1 = _gelu_exact(dot(yn, ff_w1[...]) + ff_b1[...])
    ff = dot(h1, ff_w2[...]) + ff_b2[...]
    out_ref[...] = (x2 + ls[2] * ff).reshape(B, S, D)


# ---------------------- one-time parameter preparation ------------------------

def prepare_kernel_params(p, batch, seq, nhead=NHEAD):
    """One-time re-layout of the parameters + constant helper tables.

    Call ONCE per parameter set / input shape and reuse the result: nothing here
    runs in the per-call hot path.
    """
    D = p["norm_w"].shape[1]
    H = nhead
    Dh = D // H
    M = N_STREAMS
    N = batch * seq
    Ls = H * N           # self-attention flattened key-lane count
    Lc = H * M * N       # cross-attention flattened key-lane count
    scale = 1.0 / math.sqrt(Dh)
    f32 = jnp.float32

    def split_in_proj(w_in, b_in):
        # w_in: (D, 3D) = in_proj_weight.T, b_in: (1, 3D)
        wq_t = w_in[:, 0:D] * scale        # used as  x @ wq_t    (scale folded)
        wk = w_in[:, D:2 * D].T            # used as  wk @ x^T -> K already transposed
        wv_t = w_in[:, 2 * D:3 * D]        # used as  x @ wv_t
        bq = b_in[:, 0:D] * scale          # (1, D)
        bk = b_in[:, D:2 * D].T            # (D, 1)
        bv = b_in[:, 2 * D:3 * D]          # (1, D)
        return wq_t, bq, wk, bk, wv_t, bv

    sa = split_in_proj(p["sa_win"], p["sa_bin"])
    ca = split_in_proj(p["ca_win"], p["ca_bin"])

    kp = {}
    kp["attn_w"] = jnp.stack([sa[0], sa[2], sa[4], p["sa_wout"],
                              ca[0], ca[2], ca[4], p["ca_wout"]], axis=0)
    kp["attn_b"] = jnp.stack([sa[1], sa[5], p["sa_bout"],
                              ca[1], ca[5], p["ca_bout"]], axis=0)
    kp["bk_col"] = jnp.stack([sa[3], ca[3]], axis=0)

    kp["gate_w"] = p["gate_w"]
    kp["gate_b"] = p["gate_b"]
    kp["ff_w1"], kp["ff_b1"] = p["ff_w1"], p["ff_b1"]
    kp["ff_w2"], kp["ff_b2"] = p["ff_w2"], p["ff_b2"]
    kp["norm_w"], kp["norm_b"] = p["norm_w"], p["norm_b"]
    # fold the /3.0 of the gate fusion into ls2
    kp["ls_eff"] = p["ls"] * jnp.array([1.0, 1.0 / 3.0, 1.0], f32)[:, None]

    # --- constant helper tables for the flattened-head attention ---
    head_of_d = jnp.arange(D) // Dh
    qbatch = jnp.arange(N) // seq

    lane_s = jnp.arange(Ls)                       # lane = h*N + k
    head_of_lane_s = lane_s // N
    kbatch_s = (lane_s % N) // seq
    lane_c = jnp.arange(Lc)                       # lane = h*(M*N) + m*N + k
    head_of_lane_c = lane_c // (M * N)
    stream_of_lane_c = (lane_c % (M * N)) // N
    kbatch_c = (lane_c % N) // seq
    seg_of_lane_c = lane_c // N                   # unique per (head, stream)

    kp["mask_s"] = jnp.where(qbatch[:, None] == kbatch_s[None, :],
                             0.0, NEG_INF).astype(f32)
    kp["mask_c"] = jnp.where(qbatch[:, None] == kbatch_c[None, :],
                             0.0, NEG_INF).astype(f32)
    kp["kmask_s"] = (head_of_d[:, None] == head_of_lane_s[None, :]).astype(f32)
    kp["kmask_c"] = (head_of_d[:, None] == head_of_lane_c[None, :]).astype(f32)
    kp["vmask_s"] = kp["kmask_s"].T
    kp["vmask_c"] = kp["kmask_c"].T
    kp["seg_sum_s"] = (head_of_lane_s[:, None]
                       == jnp.arange(H)[None, :]).astype(f32)
    kp["seg_bcast_s"] = kp["seg_sum_s"].T
    kp["seg_sum_c"] = (seg_of_lane_c[:, None]
                       == jnp.arange(H * M)[None, :]).astype(f32)
    kp["seg_bcast_c"] = kp["seg_sum_c"].T
    kp["gate_bcast"] = (jnp.arange(M)[:, None]
                        == stream_of_lane_c[None, :]).astype(f32)
    return kp


_PARAM_ORDER = ["attn_w", "attn_b", "bk_col",
                "gate_w", "gate_b", "gate_bcast",
                "ff_w1", "ff_b1", "ff_w2", "ff_b2",
                "norm_w", "norm_b", "ls_eff",
                "mask_s", "mask_c", "kmask_s", "kmask_c", "vmask_s", "vmask_c",
                "seg_sum_s", "seg_bcast_s", "seg_sum_c", "seg_bcast_c"]


def _full_spec(arr):
    nd = arr.ndim
    return pl.BlockSpec(arr.shape, lambda i, _nd=nd: (0,) * _nd)


def multi_cross_attention_layer(glucose, carbs, bolus, basal, kp, nhead=NHEAD):
    """Fused forward pass. `kp` is the cached output of prepare_kernel_params().

    The whole batch runs in a single grid step: at these sizes the kernel is
    latency-bound, so splitting across grid steps / TensorCores (v7x) only adds
    per-step overhead.  Revisit once B*S*D reaches a few hundred KB.
    """
    B, S, D = glucose.shape
    assert D % nhead == 0
    assert kp["mask_s"].shape == (B * S, nhead * B * S), \
        "prepare_kernel_params() was built for a different (batch, seq)"

    kernel = functools.partial(layer_kernel, nhead=nhead, batch=B, seq=S)
    data_spec = pl.BlockSpec((B, S, D), lambda i: (0, 0, 0))
    in_specs = [data_spec] * 4 + [_full_spec(kp[name]) for name in _PARAM_ORDER]
    return pl.pallas_call(
        kernel,
        out_shape=jax.ShapeDtypeStruct((B, S, D), jnp.float32),
        grid=(1,),
        in_specs=in_specs,
        out_specs=data_spec,
        compiler_params=pltpu.CompilerParams(
            dimension_semantics=("arbitrary",)),
    )(glucose, carbs, bolus, basal, *[kp[name] for name in _PARAM_ORDER])


# --------------------------- parameter initialization -------------------------

def init_params(key, d_model=D_MODEL):
    ks = jax.random.split(key, 16)

    def uni(k, fan_in, shape):
        bound = 1.0 / math.sqrt(fan_in)
        return jax.random.uniform(k, shape, jnp.float32, -bound, bound)

    p = {}
    # self-attention: in_proj stored transposed (D, 3D), out_proj (D, D)
    p["sa_win"] = uni(ks[0], d_model, (d_model, 3 * d_model))
    p["sa_bin"] = uni(ks[1], d_model, (1, 3 * d_model))
    p["sa_wout"] = uni(ks[2], d_model, (d_model, d_model))
    p["sa_bout"] = uni(ks[3], d_model, (1, d_model))
    # cross-attention
    p["ca_win"] = uni(ks[4], d_model, (d_model, 3 * d_model))
    p["ca_bin"] = uni(ks[5], d_model, (1, 3 * d_model))
    p["ca_wout"] = uni(ks[6], d_model, (d_model, d_model))
    p["ca_bout"] = uni(ks[7], d_model, (1, d_model))
    # gate: Linear(d_model, 3)
    p["gate_w"] = uni(ks[8], d_model, (d_model, 3))
    p["gate_b"] = uni(ks[9], d_model, (1, 3))
    # feed forward: Linear(d, 2d) -> GELU -> Linear(2d, d)
    p["ff_w1"] = uni(ks[10], d_model, (d_model, 2 * d_model))
    p["ff_b1"] = uni(ks[11], d_model, (1, 2 * d_model))
    p["ff_w2"] = uni(ks[12], 2 * d_model, (2 * d_model, d_model))
    p["ff_b2"] = uni(ks[13], 2 * d_model, (1, d_model))
    # layer norms (weight=1, bias=0), stacked [norm1, norm2, norm3]
    p["norm_w"] = jnp.ones((3, d_model), jnp.float32)
    p["norm_b"] = jnp.zeros((3, d_model), jnp.float32)
    # layer-scale params ls1/ls2/ls3
    p["ls"] = jnp.full((3, d_model), LAYER_SCALE_INIT, jnp.float32)
    return p


# ------------------------------ pure-JAX reference -----------------------------

def reference_forward(glucose, carbs, bolus, basal, p, nhead=NHEAD):
    def ln(x, w, b):
        mu = x.mean(-1, keepdims=True)
        var = ((x - mu) ** 2).mean(-1, keepdims=True)
        return (x - mu) / jnp.sqrt(var + EPS) * w + b

    def mha(q_in, kv_in, w_in, b_in, w_out, b_out):
        B, S, D = q_in.shape
        Dh = D // nhead
        q = q_in @ w_in[:, :D] + b_in[0, :D]
        k = kv_in @ w_in[:, D:2 * D] + b_in[0, D:2 * D]
        v = kv_in @ w_in[:, 2 * D:] + b_in[0, 2 * D:]
        q = q.reshape(B, S, nhead, Dh).transpose(0, 2, 1, 3)
        k = k.reshape(B, S, nhead, Dh).transpose(0, 2, 1, 3)
        v = v.reshape(B, S, nhead, Dh).transpose(0, 2, 1, 3)
        s = jnp.einsum("bhqd,bhkd->bhqk", q, k) / math.sqrt(Dh)
        a = jax.nn.softmax(s, axis=-1)
        o = jnp.einsum("bhqk,bhkd->bhqd", a, v).transpose(0, 2, 1, 3).reshape(B, S, D)
        return o @ w_out + b_out[0]

    nw, nb, ls = p["norm_w"], p["norm_b"], p["ls"]
    x = glucose
    xn = ln(x, nw[0], nb[0])
    x1 = x + ls[0] * mha(xn, xn, p["sa_win"], p["sa_bin"], p["sa_wout"], p["sa_bout"])
    qn = ln(x1, nw[1], nb[1])
    a_c = mha(qn, carbs, p["ca_win"], p["ca_bin"], p["ca_wout"], p["ca_bout"])
    a_bo = mha(qn, bolus, p["ca_win"], p["ca_bin"], p["ca_wout"], p["ca_bout"])
    a_ba = mha(qn, basal, p["ca_win"], p["ca_bin"], p["ca_wout"], p["ca_bout"])
    gates = jax.nn.sigmoid(qn @ p["gate_w"] + p["gate_b"][0])
    fused = (gates[..., 0:1] * a_c + gates[..., 1:2] * a_bo
             + gates[..., 2:3] * a_ba) / 3.0
    x2 = x1 + ls[1] * fused
    yn = ln(x2, nw[2], nb[2])
    pre = yn @ p["ff_w1"] + p["ff_b1"][0]
    h = 0.5 * pre * (1.0 + lax.erf(pre / math.sqrt(2.0)))
    ff = h @ p["ff_w2"] + p["ff_b2"][0]
    return x2 + ls[2] * ff


# ------------------------------------ main -------------------------------------

if __name__ == "__main__":
    B, S, D = 2, 8, D_MODEL

    key = jax.random.PRNGKey(0)
    k_g, k_c, k_bo, k_ba, k_p = jax.random.split(key, 5)
    glucose = jax.random.normal(k_g, (B, S, D), jnp.float32)
    carbs = jax.random.normal(k_c, (B, S, D), jnp.float32)
    bolus = jax.random.normal(k_bo, (B, S, D), jnp.float32)
    basal = jax.random.normal(k_ba, (B, S, D), jnp.float32)
    params = init_params(k_p, D)

    # Prepared ONCE; reused for every subsequent forward call (hot path = only
    # the pallas_call).
    kp = prepare_kernel_params(params, batch=B, seq=S, nhead=NHEAD)
    kp = jax.tree_util.tree_map(jax.block_until_ready, kp)

    out = multi_cross_attention_layer(glucose, carbs, bolus, basal, kp, nhead=NHEAD)
    out = jax.block_until_ready(out)

    ref = reference_forward(glucose, carbs, bolus, basal, params, nhead=NHEAD)
    assert out.shape == (B, S, D)
    err = float(jnp.max(jnp.abs(out - ref)))
    # tolerance covers pl.reciprocal(approx=True) in the softmax and the folded
    # constant scales (all damped by layer-scale 1e-4 before the output).
    assert jnp.allclose(out, ref, atol=2e-5, rtol=2e-5), err

    print("KERNEL_OK")
</pallas_src>

<mosaic_0001>
module attributes {stable_mosaic.version = 11 : i64} {
  func.func @layer_kernel(%arg0: i32, %arg1: memref<2x8x32xf32, #tpu.memory_space<vmem>>, %arg2: memref<2x8x32xf32, #tpu.memory_space<vmem>>, %arg3: memref<2x8x32xf32, #tpu.memory_space<vmem>>, %arg4: memref<2x8x32xf32, #tpu.memory_space<vmem>>, %arg5: memref<8x32x32xf32, #tpu.memory_space<vmem>>, %arg6: memref<6x1x32xf32, #tpu.memory_space<vmem>>, %arg7: memref<2x32x1xf32, #tpu.memory_space<vmem>>, %arg8: memref<32x3xf32, #tpu.memory_space<vmem>>, %arg9: memref<1x3xf32, #tpu.memory_space<vmem>>, %arg10: memref<3x192xf32, #tpu.memory_space<vmem>>, %arg11: memref<32x64xf32, #tpu.memory_space<vmem>>, %arg12: memref<1x64xf32, #tpu.memory_space<vmem>>, %arg13: memref<64x32xf32, #tpu.memory_space<vmem>>, %arg14: memref<1x32xf32, #tpu.memory_space<vmem>>, %arg15: memref<3x32xf32, #tpu.memory_space<vmem>>, %arg16: memref<3x32xf32, #tpu.memory_space<vmem>>, %arg17: memref<3x32xf32, #tpu.memory_space<vmem>>, %arg18: memref<16x64xf32, #tpu.memory_space<vmem>>, %arg19: memref<16x192xf32, #tpu.memory_space<vmem>>, %arg20: memref<32x64xf32, #tpu.memory_space<vmem>>, %arg21: memref<32x192xf32, #tpu.memory_space<vmem>>, %arg22: memref<64x32xf32, #tpu.memory_space<vmem>>, %arg23: memref<192x32xf32, #tpu.memory_space<vmem>>, %arg24: memref<64x4xf32, #tpu.memory_space<vmem>>, %arg25: memref<4x64xf32, #tpu.memory_space<vmem>>, %arg26: memref<192x12xf32, #tpu.memory_space<vmem>>, %arg27: memref<12x192xf32, #tpu.memory_space<vmem>>, %arg28: memref<2x8x32xf32, #tpu.memory_space<vmem>>) attributes {dimension_semantics = [#tpu.dimension_semantics<arbitrary>], iteration_bounds = array<i64: 1>, scalar_prefetch = 0 : i64, scratch_operands = 0 : i64, tpu.core_type = #tpu.core_type<tc>, window_params = [{pipeline_mode = #tpu.pipeline_mode<synchronous>, transform_indices = @transform_0, window_bounds = array<i64: 2, 8, 32>}, {pipeline_mode = #tpu.pipeline_mode<synchronous>, transform_indices = @transform_1, window_bounds = array<i64: 2, 8, 32>}, {pipeline_mode = #tpu.pipeline_mode<synchronous>, transform_indices = @transform_2, window_bounds = array<i64: 2, 8, 32>}, {pipeline_mode = #tpu.pipeline_mode<synchronous>, transform_indices = @transform_3, window_bounds = array<i64: 2, 8, 32>}, {pipeline_mode = #tpu.pipeline_mode<synchronous>, transform_indices = @transform_4, window_bounds = array<i64: 8, 32, 32>}, {pipeline_mode = #tpu.pipeline_mode<synchronous>, transform_indices = @transform_5, window_bounds = array<i64: 6, 1, 32>}, {pipeline_mode = #tpu.pipeline_mode<synchronous>, transform_indices = @transform_6, window_bounds = array<i64: 2, 32, 1>}, {pipeline_mode = #tpu.pipeline_mode<synchronous>, transform_indices = @transform_7, window_bounds = array<i64: 32, 3>}, {pipeline_mode = #tpu.pipeline_mode<synchronous>, transform_indices = @transform_8, window_bounds = array<i64: 1, 3>}, {pipeline_mode = #tpu.pipeline_mode<synchronous>, transform_indices = @transform_9, window_bounds = array<i64: 3, 192>}, {pipeline_mode = #tpu.pipeline_mode<synchronous>, transform_indices = @transform_10, window_bounds = array<i64: 32, 64>}, {pipeline_mode = #tpu.pipeline_mode<synchronous>, transform_indices = @transform_11, window_bounds = array<i64: 1, 64>}, {pipeline_mode = #tpu.pipeline_mode<synchronous>, transform_indices = @transform_12, window_bounds = array<i64: 64, 32>}, {pipeline_mode = #tpu.pipeline_mode<synchronous>, transform_indices = @transform_13, window_bounds = array<i64: 1, 32>}, {pipeline_mode = #tpu.pipeline_mode<synchronous>, transform_indices = @transform_14, window_bounds = array<i64: 3, 32>}, {pipeline_mode = #tpu.pipeline_mode<synchronous>, transform_indices = @transform_15, window_bounds = array<i64: 3, 32>}, {pipeline_mode = #tpu.pipeline_mode<synchronous>, transform_indices = @transform_16, window_bounds = array<i64: 3, 32>}, {pipeline_mode = #tpu.pipeline_mode<synchronous>, transform_indices = @transform_17, window_bounds = array<i64: 16, 64>}, {pipeline_mode = #tpu.pipeline_mode<synchronous>, transform_indices = @transform_18, window_bounds = array<i64: 16, 192>}, {pipeline_mode = #tpu.pipeline_mode<synchronous>, transform_indices = @transform_19, window_bounds = array<i64: 32, 64>}, {pipeline_mode = #tpu.pipeline_mode<synchronous>, transform_indices = @transform_20, window_bounds = array<i64: 32, 192>}, {pipeline_mode = #tpu.pipeline_mode<synchronous>, transform_indices = @transform_21, window_bounds = array<i64: 64, 32>}, {pipeline_mode = #tpu.pipeline_mode<synchronous>, transform_indices = @transform_22, window_bounds = array<i64: 192, 32>}, {pipeline_mode = #tpu.pipeline_mode<synchronous>, transform_indices = @transform_23, window_bounds = array<i64: 64, 4>}, {pipeline_mode = #tpu.pipeline_mode<synchronous>, transform_indices = @transform_24, window_bounds = array<i64: 4, 64>}, {pipeline_mode = #tpu.pipeline_mode<synchronous>, transform_indices = @transform_25, window_bounds = array<i64: 192, 12>}, {pipeline_mode = #tpu.pipeline_mode<synchronous>, transform_indices = @transform_26, window_bounds = array<i64: 12, 192>}, {pipeline_mode = #tpu.pipeline_mode<synchronous>, transform_indices = @transform_27, window_bounds = array<i64: 2, 8, 32>}]} {
    %c0 = arith.constant 0 : index
    %c0_0 = arith.constant 0 : index
    %c0_1 = arith.constant 0 : index
    %0 = vector.load %arg1[%c0, %c0_0, %c0_1] : memref<2x8x32xf32, #tpu.memory_space<vmem>>, vector<2x8x32xf32>
    %1 = vector.shape_cast %0 : vector<2x8x32xf32> to vector<16x32xf32>
    %c0_2 = arith.constant 0 : index
    %c0_3 = arith.constant 0 : index
    %2 = vector.load %arg15[%c0_2, %c0_3] : memref<3x32xf32, #tpu.memory_space<vmem>>, vector<3x32xf32>
    %c0_4 = arith.constant 0 : index
    %c0_5 = arith.constant 0 : index
    %3 = vector.load %arg16[%c0_4, %c0_5] : memref<3x32xf32, #tpu.memory_space<vmem>>, vector<3x32xf32>
    %c0_6 = arith.constant 0 : index
    %c0_7 = arith.constant 0 : index
    %4 = vector.load %arg17[%c0_6, %c0_7] : memref<3x32xf32, #tpu.memory_space<vmem>>, vector<3x32xf32>
    %5 = vector.extract_strided_slice %2 {offsets = [0, 0], sizes = [1, 32], strides = [1, 1]} : vector<3x32xf32> to vector<1x32xf32>
    %6 = vector.shape_cast %5 : vector<1x32xf32> to vector<32xf32>
    %7 = vector.extract_strided_slice %3 {offsets = [0, 0], sizes = [1, 32], strides = [1, 1]} : vector<3x32xf32> to vector<1x32xf32>
    %8 = vector.shape_cast %7 : vector<1x32xf32> to vector<32xf32>
    %cst = arith.constant dense<0.000000e+00> : vector<16xf32>
    %9 = vector.multi_reduction <add>, %1, %cst [1] : vector<16x32xf32> to vector<16xf32>
    %10 = vector.shape_cast %9 : vector<16xf32> to vector<16x1xf32>
    %cst_8 = arith.constant 3.200000e+01 : f32
    %11 = vector.broadcast %cst_8 : f32 to vector<16x1xf32>
    %12 = arith.divf %10, %11 : vector<16x1xf32>
    %13 = vector.broadcast %12 : vector<16x1xf32> to vector<16x32xf32>
    %14 = arith.subf %1, %13 : vector<16x32xf32>
    %15 = arith.mulf %14, %14 : vector<16x32xf32>
    %cst_9 = arith.constant dense<0.000000e+00> : vector<16xf32>
    %16 = vector.multi_reduction <add>, %15, %cst_9 [1] : vector<16x32xf32> to vector<16xf32>
    %17 = vector.shape_cast %16 : vector<16xf32> to vector<16x1xf32>
    %cst_10 = arith.constant 3.200000e+01 : f32
    %18 = vector.broadcast %cst_10 : f32 to vector<16x1xf32>
    %19 = arith.divf %17, %18 : vector<16x1xf32>
    %cst_11 = arith.constant 9.99999974E-6 : f32
    %20 = vector.broadcast %cst_11 : f32 to vector<16x1xf32>
    %21 = arith.addf %19, %20 : vector<16x1xf32>
    %22 = math.rsqrt %21 : vector<16x1xf32>
    %23 = vector.broadcast %22 : vector<16x1xf32> to vector<16x32xf32>
    %24 = arith.mulf %14, %23 : vector<16x32xf32>
    %25 = vector.shape_cast %6 : vector<32xf32> to vector<1x32xf32>
    %26 = vector.broadcast %25 : vector<1x32xf32> to vector<16x32xf32>
    %27 = arith.mulf %24, %26 : vector<16x32xf32>
    %28 = vector.shape_cast %8 : vector<32xf32> to vector<1x32xf32>
    %29 = vector.broadcast %28 : vector<1x32xf32> to vector<16x32xf32>
    %30 = arith.addf %27, %29 : vector<16x32xf32>
    %c0_12 = arith.constant 0 : index
    %c0_13 = arith.constant 0 : index
    %c0_14 = arith.constant 0 : index
    %31 = vector.load %arg5[%c0_12, %c0_13, %c0_14] : memref<8x32x32xf32, #tpu.memory_space<vmem>>, vector<1x32x32xf32>
    %32 = vector.shape_cast %31 : vector<1x32x32xf32> to vector<32x32xf32>
    %c0_15 = arith.constant 0 : index
    %c0_16 = arith.constant 0 : index
    %c0_17 = arith.constant 0 : index
    %33 = vector.load %arg6[%c0_15, %c0_16, %c0_17] : memref<6x1x32xf32, #tpu.memory_space<vmem>>, vector<1x1x32xf32>
    %34 = vector.shape_cast %33 : vector<1x1x32xf32> to vector<1x32xf32>
    %c1 = arith.constant 1 : index
    %c0_18 = arith.constant 0 : index
    %c0_19 = arith.constant 0 : index
    %35 = vector.load %arg5[%c1, %c0_18, %c0_19] : memref<8x32x32xf32, #tpu.memory_space<vmem>>, vector<1x32x32xf32>
    %36 = vector.shape_cast %35 : vector<1x32x32xf32> to vector<32x32xf32>
    %c0_20 = arith.constant 0 : index
    %c0_21 = arith.constant 0 : index
    %c0_22 = arith.constant 0 : index
    %37 = vector.load %arg7[%c0_20, %c0_21, %c0_22] : memref<2x32x1xf32, #tpu.memory_space<vmem>>, vector<1x32x1xf32>
    %38 = vector.shape_cast %37 : vector<1x32x1xf32> to vector<32x1xf32>
    %c2 = arith.constant 2 : index
    %c0_23 = arith.constant 0 : index
    %c0_24 = arith.constant 0 : index
    %39 = vector.load %arg5[%c2, %c0_23, %c0_24] : memref<8x32x32xf32, #tpu.memory_space<vmem>>, vector<1x32x32xf32>
    %40 = vector.shape_cast %39 : vector<1x32x32xf32> to vector<32x32xf32>
    %c1_25 = arith.constant 1 : index
    %c0_26 = arith.constant 0 : index
    %c0_27 = arith.constant 0 : index
    %41 = vector.load %arg6[%c1_25, %c0_26, %c0_27] : memref<6x1x32xf32, #tpu.memory_space<vmem>>, vector<1x1x32xf32>
    %42 = vector.shape_cast %41 : vector<1x1x32xf32> to vector<1x32xf32>
    %c0_28 = arith.constant 0 : index
    %c0_29 = arith.constant 0 : index
    %43 = vector.load %arg18[%c0_28, %c0_29] : memref<16x64xf32, #tpu.memory_space<vmem>>, vector<16x64xf32>
    %c0_30 = arith.constant 0 : index
    %c0_31 = arith.constant 0 : index
    %44 = vector.load %arg20[%c0_30, %c0_31] : memref<32x64xf32, #tpu.memory_space<vmem>>, vector<32x64xf32>
    %c0_32 = arith.constant 0 : index
    %c0_33 = arith.constant 0 : index
    %45 = vector.load %arg22[%c0_32, %c0_33] : memref<64x32xf32, #tpu.memory_space<vmem>>, vector<64x32xf32>
    %c0_34 = arith.constant 0 : index
    %c0_35 = arith.constant 0 : index
    %46 = vector.load %arg24[%c0_34, %c0_35] : memref<64x4xf32, #tpu.memory_space<vmem>>, vector<64x4xf32>
    %c0_36 = arith.constant 0 : index
    %c0_37 = arith.constant 0 : index
    %47 = vector.load %arg25[%c0_36, %c0_37] : memref<4x64xf32, #tpu.memory_space<vmem>>, vector<4x64xf32>
    %cst_38 = arith.constant dense<0.000000e+00> : vector<16x32xf32>
    %48 = tpu.matmul %30, %32, %cst_38 {dimension_numbers = #tpu.dot_dimension_numbers<[1], [0], [0], [1], [0, 0, 1, 1], [], []>} : vector<16x32xf32>, vector<32x32xf32>, vector<16x32xf32> -> vector<16x32xf32>
    %49 = vector.broadcast %34 : vector<1x32xf32> to vector<16x32xf32>
    %50 = arith.addf %48, %49 : vector<16x32xf32>
    "tpu.trace_start"() <{level = 10 : i32, message = "ed,nd->en"}> : () -> ()
    %cst_39 = arith.constant dense<0.000000e+00> : vector<32x16xf32>
    %51 = tpu.matmul %36, %30, %cst_39 {dimension_numbers = #tpu.dot_dimension_numbers<[1], [1], [0], [0], [0, 0, 1, 0], [], []>} : vector<32x32xf32>, vector<16x32xf32>, vector<32x16xf32> -> vector<32x16xf32>
    "tpu.trace_stop"() : () -> ()
    %52 = vector.broadcast %38 : vector<32x1xf32> to vector<32x16xf32>
    %53 = arith.addf %51, %52 : vector<32x16xf32>
    %cst_40 = arith.constant dense<0.000000e+00> : vector<16x32xf32>
    %54 = tpu.matmul %30, %40, %cst_40 {dimension_numbers = #tpu.dot_dimension_numbers<[1], [0], [0], [1], [0, 0, 1, 1], [], []>} : vector<16x32xf32>, vector<32x32xf32>, vector<16x32xf32> -> vector<16x32xf32>
    %55 = vector.broadcast %42 : vector<1x32xf32> to vector<16x32xf32>
    %56 = arith.addf %54, %55 : vector<16x32xf32>
    %57 = tpu.concatenate %53, %53, %53, %53 in 1 : vector<32x16xf32>, vector<32x16xf32>, vector<32x16xf32>, vector<32x16xf32> -> vector<32x64xf32>
    %58 = arith.mulf %57, %44 : vector<32x64xf32>
    %59 = tpu.concatenate %56, %56, %56, %56 in 0 : vector<16x32xf32>, vector<16x32xf32>, vector<16x32xf32>, vector<16x32xf32> -> vector<64x32xf32>
    %60 = arith.mulf %59, %45 : vector<64x32xf32>
    %cst_41 = arith.constant dense<0.000000e+00> : vector<16x64xf32>
    %61 = tpu.matmul %50, %58, %cst_41 {dimension_numbers = #tpu.dot_dimension_numbers<[1], [0], [0], [1], [0, 0, 1, 1], [], []>} : vector<16x32xf32>, vector<32x64xf32>, vector<16x64xf32> -> vector<16x64xf32>
    %62 = arith.addf %61, %43 : vector<16x64xf32>
    %cst_42 = arith.constant dense<0xFF800000> : vector<16xf32>
    %63 = vector.multi_reduction <maximumf>, %62, %cst_42 [1] : vector<16x64xf32> to vector<16xf32>
    %64 = vector.shape_cast %63 : vector<16xf32> to vector<16x1xf32>
    %65 = vector.broadcast %64 : vector<16x1xf32> to vector<16x64xf32>
    %66 = arith.subf %62, %65 : vector<16x64xf32>
    %67 = math.exp %66 : vector<16x64xf32>
    %cst_43 = arith.constant dense<0.000000e+00> : vector<16x4xf32>
    %68 = tpu.matmul %67, %46, %cst_43 {dimension_numbers = #tpu.dot_dimension_numbers<[1], [0], [0], [1], [0, 0, 1, 1], [], []>} : vector<16x64xf32>, vector<64x4xf32>, vector<16x4xf32> -> vector<16x4xf32>
    %69 = tpu.reciprocal %68 {approx = true} : vector<16x4xf32> -> vector<16x4xf32>
    %cst_44 = arith.constant dense<0.000000e+00> : vector<16x64xf32>
    %70 = tpu.matmul %69, %47, %cst_44 {dimension_numbers = #tpu.dot_dimension_numbers<[1], [0], [0], [1], [0, 0, 1, 1], [], []>} : vector<16x4xf32>, vector<4x64xf32>, vector<16x64xf32> -> vector<16x64xf32>
    %71 = arith.mulf %67, %70 : vector<16x64xf32>
    %cst_45 = arith.constant dense<0.000000e+00> : vector<16x32xf32>
    %72 = tpu.matmul %71, %60, %cst_45 {dimension_numbers = #tpu.dot_dimension_numbers<[1], [0], [0], [1], [0, 0, 1, 1], [], []>} : vector<16x64xf32>, vector<64x32xf32>, vector<16x32xf32> -> vector<16x32xf32>
    %73 = vector.extract_strided_slice %4 {offsets = [0, 0], sizes = [1, 32], strides = [1, 1]} : vector<3x32xf32> to vector<1x32xf32>
    %74 = vector.shape_cast %73 : vector<1x32xf32> to vector<32xf32>
    %c3 = arith.constant 3 : index
    %c0_46 = arith.constant 0 : index
    %c0_47 = arith.constant 0 : index
    %75 = vector.load %arg5[%c3, %c0_46, %c0_47] : memref<8x32x32xf32, #tpu.memory_space<vmem>>, vector<1x32x32xf32>
    %76 = vector.shape_cast %75 : vector<1x32x32xf32> to vector<32x32xf32>
    %cst_48 = arith.constant dense<0.000000e+00> : vector<16x32xf32>
    %77 = tpu.matmul %72, %76, %cst_48 {dimension_numbers = #tpu.dot_dimension_numbers<[1], [0], [0], [1], [0, 0, 1, 1], [], []>} : vector<16x32xf32>, vector<32x32xf32>, vector<16x32xf32> -> vector<16x32xf32>
    %c2_49 = arith.constant 2 : index
    %c0_50 = arith.constant 0 : index
    %c0_51 = arith.constant 0 : index
    %78 = vector.load %arg6[%c2_49, %c0_50, %c0_51] : memref<6x1x32xf32, #tpu.memory_space<vmem>>, vector<1x1x32xf32>
    %79 = vector.shape_cast %78 : vector<1x1x32xf32> to vector<1x32xf32>
    %80 = vector.broadcast %79 : vector<1x32xf32> to vector<16x32xf32>
    %81 = arith.addf %77, %80 : vector<16x32xf32>
    %82 = vector.shape_cast %74 : vector<32xf32> to vector<1x32xf32>
    %83 = vector.broadcast %82 : vector<1x32xf32> to vector<16x32xf32>
    %84 = arith.mulf %83, %81 : vector<16x32xf32>
    %85 = arith.addf %1, %84 : vector<16x32xf32>
    %86 = vector.extract_strided_slice %2 {offsets = [1, 0], sizes = [1, 32], strides = [1, 1]} : vector<3x32xf32> to vector<1x32xf32>
    %87 = vector.shape_cast %86 : vector<1x32xf32> to vector<32xf32>
    %88 = vector.extract_strided_slice %3 {offsets = [1, 0], sizes = [1, 32], strides = [1, 1]} : vector<3x32xf32> to vector<1x32xf32>
    %89 = vector.shape_cast %88 : vector<1x32xf32> to vector<32xf32>
    %cst_52 = arith.constant dense<0.000000e+00> : vector<16xf32>
    %90 = vector.multi_reduction <add>, %85, %cst_52 [1] : vector<16x32xf32> to vector<16xf32>
    %91 = vector.shape_cast %90 : vector<16xf32> to vector<16x1xf32>
    %cst_53 = arith.constant 3.200000e+01 : f32
    %92 = vector.broadcast %cst_53 : f32 to vector<16x1xf32>
    %93 = arith.divf %91, %92 : vector<16x1xf32>
    %94 = vector.broadcast %93 : vector<16x1xf32> to vector<16x32xf32>
    %95 = arith.subf %85, %94 : vector<16x32xf32>
    %96 = arith.mulf %95, %95 : vector<16x32xf32>
    %cst_54 = arith.constant dense<0.000000e+00> : vector<16xf32>
    %97 = vector.multi_reduction <add>, %96, %cst_54 [1] : vector<16x32xf32> to vector<16xf32>
    %98 = vector.shape_cast %97 : vector<16xf32> to vector<16x1xf32>
    %cst_55 = arith.constant 3.200000e+01 : f32
    %99 = vector.broadcast %cst_55 : f32 to vector<16x1xf32>
    %100 = arith.divf %98, %99 : vector<16x1xf32>
    %cst_56 = arith.constant 9.99999974E-6 : f32
    %101 = vector.broadcast %cst_56 : f32 to vector<16x1xf32>
    %102 = arith.addf %100, %101 : vector<16x1xf32>
    %103 = math.rsqrt %102 : vector<16x1xf32>
    %104 = vector.broadcast %103 : vector<16x1xf32> to vector<16x32xf32>
    %105 = arith.mulf %95, %104 : vector<16x32xf32>
    %106 = vector.shape_cast %87 : vector<32xf32> to vector<1x32xf32>
    %107 = vector.broadcast %106 : vector<1x32xf32> to vector<16x32xf32>
    %108 = arith.mulf %105, %107 : vector<16x32xf32>
    %109 = vector.shape_cast %89 : vector<32xf32> to vector<1x32xf32>
    %110 = vector.broadcast %109 : vector<1x32xf32> to vector<16x32xf32>
    %111 = arith.addf %108, %110 : vector<16x32xf32>
    %c0_57 = arith.constant 0 : index
    %c0_58 = arith.constant 0 : index
    %c0_59 = arith.constant 0 : index
    %112 = vector.load %arg2[%c0_57, %c0_58, %c0_59] : memref<2x8x32xf32, #tpu.memory_space<vmem>>, vector<2x8x32xf32>
    %113 = vector.shape_cast %112 : vector<2x8x32xf32> to vector<16x32xf32>
    %c0_60 = arith.constant 0 : index
    %c0_61 = arith.constant 0 : index
    %c0_62 = arith.constant 0 : index
    %114 = vector.load %arg3[%c0_60, %c0_61, %c0_62] : memref<2x8x32xf32, #tpu.memory_space<vmem>>, vector<2x8x32xf32>
    %115 = vector.shape_cast %114 : vector<2x8x32xf32> to vector<16x32xf32>
    %c0_63 = arith.constant 0 : index
    %c0_64 = arith.constant 0 : index
    %c0_65 = arith.constant 0 : index
    %116 = vector.load %arg4[%c0_63, %c0_64, %c0_65] : memref<2x8x32xf32, #tpu.memory_space<vmem>>, vector<2x8x32xf32>
    %117 = vector.shape_cast %116 : vector<2x8x32xf32> to vector<16x32xf32>
    %118 = tpu.concatenate %113, %115, %117 in 0 : vector<16x32xf32>, vector<16x32xf32>, vector<16x32xf32> -> vector<48x32xf32>
    %c0_66 = arith.constant 0 : index
    %c0_67 = arith.constant 0 : index
    %119 = vector.load %arg8[%c0_66, %c0_67] : memref<32x3xf32, #tpu.memory_space<vmem>>, vector<32x3xf32>
    %cst_68 = arith.constant dense<0.000000e+00> : vector<16x3xf32>
    %120 = tpu.matmul %111, %119, %cst_68 {dimension_numbers = #tpu.dot_dimension_numbers<[1], [0], [0], [1], [0, 0, 1, 1], [], []>} : vector<16x32xf32>, vector<32x3xf32>, vector<16x3xf32> -> vector<16x3xf32>
    %c0_69 = arith.constant 0 : index
    %c0_70 = arith.constant 0 : index
    %121 = vector.load %arg9[%c0_69, %c0_70] : memref<1x3xf32, #tpu.memory_space<vmem>>, vector<1x3xf32>
    %122 = vector.broadcast %121 : vector<1x3xf32> to vector<16x3xf32>
    %123 = arith.addf %120, %122 : vector<16x3xf32>
    %124 = arith.negf %123 : vector<16x3xf32>
    %125 = math.exp %124 : vector<16x3xf32>
    %cst_71 = arith.constant 1.000000e+00 : f32
    %126 = vector.broadcast %cst_71 : f32 to vector<16x3xf32>
    %127 = arith.addf %126, %125 : vector<16x3xf32>
    %128 = arith.divf %126, %127 : vector<16x3xf32>
    %c0_72 = arith.constant 0 : index
    %c0_73 = arith.constant 0 : index
    %129 = vector.load %arg10[%c0_72, %c0_73] : memref<3x192xf32, #tpu.memory_space<vmem>>, vector<3x192xf32>
    %cst_74 = arith.constant dense<0.000000e+00> : vector<16x192xf32>
    %130 = tpu.matmul %128, %129, %cst_74 {dimension_numbers = #tpu.dot_dimension_numbers<[1], [0], [0], [1], [0, 0, 1, 1], [], []>} : vector<16x3xf32>, vector<3x192xf32>, vector<16x192xf32> -> vector<16x192xf32>
    %c4 = arith.constant 4 : index
    %c0_75 = arith.constant 0 : index
    %c0_76 = arith.constant 0 : index
    %131 = vector.load %arg5[%c4, %c0_75, %c0_76] : memref<8x32x32xf32, #tpu.memory_space<vmem>>, vector<1x32x32xf32>
    %132 = vector.shape_cast %131 : vector<1x32x32xf32> to vector<32x32xf32>
    %c3_77 = arith.constant 3 : index
    %c0_78 = arith.constant 0 : index
    %c0_79 = arith.constant 0 : index
    %133 = vector.load %arg6[%c3_77, %c0_78, %c0_79] : memref<6x1x32xf32, #tpu.memory_space<vmem>>, vector<1x1x32xf32>
    %134 = vector.shape_cast %133 : vector<1x1x32xf32> to vector<1x32xf32>
    %c5 = arith.constant 5 : index
    %c0_80 = arith.constant 0 : index
    %c0_81 = arith.constant 0 : index
    %135 = vector.load %arg5[%c5, %c0_80, %c0_81] : memref<8x32x32xf32, #tpu.memory_space<vmem>>, vector<1x32x32xf32>
    %136 = vector.shape_cast %135 : vector<1x32x32xf32> to vector<32x32xf32>
    %c1_82 = arith.constant 1 : index
    %c0_83 = arith.constant 0 : index
    %c0_84 = arith.constant 0 : index
    %137 = vector.load %arg7[%c1_82, %c0_83, %c0_84] : memref<2x32x1xf32, #tpu.memory_space<vmem>>, vector<1x32x1xf32>
    %138 = vector.shape_cast %137 : vector<1x32x1xf32> to vector<32x1xf32>
    %c6 = arith.constant 6 : index
    %c0_85 = arith.constant 0 : index
    %c0_86 = arith.constant 0 : index
    %139 = vector.load %arg5[%c6, %c0_85, %c0_86] : memref<8x32x32xf32, #tpu.memory_space<vmem>>, vector<1x32x32xf32>
    %140 = vector.shape_cast %139 : vector<1x32x32xf32> to vector<32x32xf32>
    %c4_87 = arith.constant 4 : index
    %c0_88 = arith.constant 0 : index
    %c0_89 = arith.constant 0 : index
    %141 = vector.load %arg6[%c4_87, %c0_88, %c0_89] : memref<6x1x32xf32, #tpu.memory_space<vmem>>, vector<1x1x32xf32>
    %142 = vector.shape_cast %141 : vector<1x1x32xf32> to vector<1x32xf32>
    %c0_90 = arith.constant 0 : index
    %c0_91 = arith.constant 0 : index
    %143 = vector.load %arg19[%c0_90, %c0_91] : memref<16x192xf32, #tpu.memory_space<vmem>>, vector<16x192xf32>
    %c0_92 = arith.constant 0 : index
    %c0_93 = arith.constant 0 : index
    %144 = vector.load %arg21[%c0_92, %c0_93] : memref<32x192xf32, #tpu.memory_space<vmem>>, vector<32x192xf32>
    %c0_94 = arith.constant 0 : index
    %c0_95 = arith.constant 0 : index
    %145 = vector.load %arg23[%c0_94, %c0_95] : memref<192x32xf32, #tpu.memory_space<vmem>>, vector<192x32xf32>
    %c0_96 = arith.constant 0 : index
    %c0_97 = arith.constant 0 : index
    %146 = vector.load %arg26[%c0_96, %c0_97] : memref<192x12xf32, #tpu.memory_space<vmem>>, vector<192x12xf32>
    %c0_98 = arith.constant 0 : index
    %c0_99 = arith.constant 0 : index
    %147 = vector.load %arg27[%c0_98, %c0_99] : memref<12x192xf32, #tpu.memory_space<vmem>>, vector<12x192xf32>
    %cst_100 = arith.constant dense<0.000000e+00> : vector<16x32xf32>
    %148 = tpu.matmul %111, %132, %cst_100 {dimension_numbers = #tpu.dot_dimension_numbers<[1], [0], [0], [1], [0, 0, 1, 1], [], []>} : vector<16x32xf32>, vector<32x32xf32>, vector<16x32xf32> -> vector<16x32xf32>
    %149 = vector.broadcast %134 : vector<1x32xf32> to vector<16x32xf32>
    %150 = arith.addf %148, %149 : vector<16x32xf32>
    "tpu.trace_start"() <{level = 10 : i32, message = "ed,nd->en"}> : () -> ()
    %cst_101 = arith.constant dense<0.000000e+00> : vector<32x48xf32>
    %151 = tpu.matmul %136, %118, %cst_101 {dimension_numbers = #tpu.dot_dimension_numbers<[1], [1], [0], [0], [0, 0, 1, 0], [], []>} : vector<32x32xf32>, vector<48x32xf32>, vector<32x48xf32> -> vector<32x48xf32>
    "tpu.trace_stop"() : () -> ()
    %152 = vector.broadcast %138 : vector<32x1xf32> to vector<32x48xf32>
    %153 = arith.addf %151, %152 : vector<32x48xf32>
    %cst_102 = arith.constant dense<0.000000e+00> : vector<48x32xf32>
    %154 = tpu.matmul %118, %140, %cst_102 {dimension_numbers = #tpu.dot_dimension_numbers<[1], [0], [0], [1], [0, 0, 1, 1], [], []>} : vector<48x32xf32>, vector<32x32xf32>, vector<48x32xf32> -> vector<48x32xf32>
    %155 = vector.broadcast %142 : vector<1x32xf32> to vector<48x32xf32>
    %156 = arith.addf %154, %155 : vector<48x32xf32>
    %157 = tpu.concatenate %153, %153, %153, %153 in 1 : vector<32x48xf32>, vector<32x48xf32>, vector<32x48xf32>, vector<32x48xf32> -> vector<32x192xf32>
    %158 = arith.mulf %157, %144 : vector<32x192xf32>
    %159 = tpu.concatenate %156, %156, %156, %156 in 0 : vector<48x32xf32>, vector<48x32xf32>, vector<48x32xf32>, vector<48x32xf32> -> vector<192x32xf32>
    %160 = arith.mulf %159, %145 : vector<192x32xf32>
    %cst_103 = arith.constant dense<0.000000e+00> : vector<16x192xf32>
    %161 = tpu.matmul %150, %158, %cst_103 {dimension_numbers = #tpu.dot_dimension_numbers<[1], [0], [0], [1], [0, 0, 1, 1], [], []>} : vector<16x32xf32>, vector<32x192xf32>, vector<16x192xf32> -> vector<16x192xf32>
    %162 = arith.addf %161, %143 : vector<16x192xf32>
    %cst_104 = arith.constant dense<0xFF800000> : vector<16xf32>
    %163 = vector.multi_reduction <maximumf>, %162, %cst_104 [1] : vector<16x192xf32> to vector<16xf32>
    %164 = vector.shape_cast %163 : vector<16xf32> to vector<16x1xf32>
    %165 = vector.broadcast %164 : vector<16x1xf32> to vector<16x192xf32>
    %166 = arith.subf %162, %165 : vector<16x192xf32>
    %167 = math.exp %166 : vector<16x192xf32>
    %cst_105 = arith.constant dense<0.000000e+00> : vector<16x12xf32>
    %168 = tpu.matmul %167, %146, %cst_105 {dimension_numbers = #tpu.dot_dimension_numbers<[1], [0], [0], [1], [0, 0, 1, 1], [], []>} : vector<16x192xf32>, vector<192x12xf32>, vector<16x12xf32> -> vector<16x12xf32>
    %169 = tpu.reciprocal %168 {approx = true} : vector<16x12xf32> -> vector<16x12xf32>
    %cst_106 = arith.constant dense<0.000000e+00> : vector<16x192xf32>
    %170 = tpu.matmul %169, %147, %cst_106 {dimension_numbers = #tpu.dot_dimension_numbers<[1], [0], [0], [1], [0, 0, 1, 1], [], []>} : vector<16x12xf32>, vector<12x192xf32>, vector<16x192xf32> -> vector<16x192xf32>
    %171 = arith.mulf %167, %170 : vector<16x192xf32>
    %172 = arith.mulf %171, %130 : vector<16x192xf32>
    %cst_107 = arith.constant dense<0.000000e+00> : vector<16x32xf32>
    %173 = tpu.matmul %172, %160, %cst_107 {dimension_numbers = #tpu.dot_dimension_numbers<[1], [0], [0], [1], [0, 0, 1, 1], [], []>} : vector<16x192xf32>, vector<192x32xf32>, vector<16x32xf32> -> vector<16x32xf32>
    %cst_108 = arith.constant dense<0.000000e+00> : vector<16xf32>
    %174 = vector.multi_reduction <add>, %128, %cst_108 [1] : vector<16x3xf32> to vector<16xf32>
    %175 = vector.shape_cast %174 : vector<16xf32> to vector<16x1xf32>
    %c7 = arith.constant 7 : index
    %c0_109 = arith.constant 0 : index
    %c0_110 = arith.constant 0 : index
    %176 = vector.load %arg5[%c7, %c0_109, %c0_110] : memref<8x32x32xf32, #tpu.memory_space<vmem>>, vector<1x32x32xf32>
    %177 = vector.shape_cast %176 : vector<1x32x32xf32> to vector<32x32xf32>
    %cst_111 = arith.constant dense<0.000000e+00> : vector<16x32xf32>
    %178 = tpu.matmul %173, %177, %cst_111 {dimension_numbers = #tpu.dot_dimension_numbers<[1], [0], [0], [1], [0, 0, 1, 1], [], []>} : vector<16x32xf32>, vector<32x32xf32>, vector<16x32xf32> -> vector<16x32xf32>
    %c5_112 = arith.constant 5 : index
    %c0_113 = arith.constant 0 : index
    %c0_114 = arith.constant 0 : index
    %179 = vector.load %arg6[%c5_112, %c0_113, %c0_114] : memref<6x1x32xf32, #tpu.memory_space<vmem>>, vector<1x1x32xf32>
    %180 = vector.shape_cast %179 : vector<1x1x32xf32> to vector<1x32xf32>
    %181 = vector.broadcast %175 : vector<16x1xf32> to vector<16x32xf32>
    %182 = vector.broadcast %180 : vector<1x32xf32> to vector<16x32xf32>
    %183 = arith.mulf %181, %182 : vector<16x32xf32>
    %184 = arith.addf %178, %183 : vector<16x32xf32>
    %185 = vector.extract_strided_slice %4 {offsets = [1, 0], sizes = [1, 32], strides = [1, 1]} : vector<3x32xf32> to vector<1x32xf32>
    %186 = vector.shape_cast %185 : vector<1x32xf32> to vector<32xf32>
    %187 = vector.shape_cast %186 : vector<32xf32> to vector<1x32xf32>
    %188 = vector.broadcast %187 : vector<1x32xf32> to vector<16x32xf32>
    %189 = arith.mulf %188, %184 : vector<16x32xf32>
    %190 = arith.addf %85, %189 : vector<16x32xf32>
    %191 = vector.extract_strided_slice %2 {offsets = [2, 0], sizes = [1, 32], strides = [1, 1]} : vector<3x32xf32> to vector<1x32xf32>
    %192 = vector.shape_cast %191 : vector<1x32xf32> to vector<32xf32>
    %193 = vector.extract_strided_slice %3 {offsets = [2, 0], sizes = [1, 32], strides = [1, 1]} : vector<3x32xf32> to vector<1x32xf32>
    %194 = vector.shape_cast %193 : vector<1x32xf32> to vector<32xf32>
    %cst_115 = arith.constant dense<0.000000e+00> : vector<16xf32>
    %195 = vector.multi_reduction <add>, %190, %cst_115 [1] : vector<16x32xf32> to vector<16xf32>
    %196 = vector.shape_cast %195 : vector<16xf32> to vector<16x1xf32>
    %cst_116 = arith.constant 3.200000e+01 : f32
    %197 = vector.broadcast %cst_116 : f32 to vector<16x1xf32>
    %198 = arith.divf %196, %197 : vector<16x1xf32>
    %199 = vector.broadcast %198 : vector<16x1xf32> to vector<16x32xf32>
    %200 = arith.subf %190, %199 : vector<16x32xf32>
    %201 = arith.mulf %200, %200 : vector<16x32xf32>
    %cst_117 = arith.constant dense<0.000000e+00> : vector<16xf32>
    %202 = vector.multi_reduction <add>, %201, %cst_117 [1] : vector<16x32xf32> to vector<16xf32>
    %203 = vector.shape_cast %202 : vector<16xf32> to vector<16x1xf32>
    %cst_118 = arith.constant 3.200000e+01 : f32
    %204 = vector.broadcast %cst_118 : f32 to vector<16x1xf32>
    %205 = arith.divf %203, %204 : vector<16x1xf32>
    %cst_119 = arith.constant 9.99999974E-6 : f32
    %206 = vector.broadcast %cst_119 : f32 to vector<16x1xf32>
    %207 = arith.addf %205, %206 : vector<16x1xf32>
    %208 = math.rsqrt %207 : vector<16x1xf32>
    %209 = vector.broadcast %208 : vector<16x1xf32> to vector<16x32xf32>
    %210 = arith.mulf %200, %209 : vector<16x32xf32>
    %211 = vector.shape_cast %192 : vector<32xf32> to vector<1x32xf32>
    %212 = vector.broadcast %211 : vector<1x32xf32> to vector<16x32xf32>
    %213 = arith.mulf %210, %212 : vector<16x32xf32>
    %214 = vector.shape_cast %194 : vector<32xf32> to vector<1x32xf32>
    %215 = vector.broadcast %214 : vector<1x32xf32> to vector<16x32xf32>
    %216 = arith.addf %213, %215 : vector<16x32xf32>
    %c0_120 = arith.constant 0 : index
    %c0_121 = arith.constant 0 : index
    %217 = vector.load %arg11[%c0_120, %c0_121] : memref<32x64xf32, #tpu.memory_space<vmem>>, vector<32x64xf32>
    %cst_122 = arith.constant dense<0.000000e+00> : vector<16x64xf32>
    %218 = tpu.matmul %216, %217, %cst_122 {dimension_numbers = #tpu.dot_dimension_numbers<[1], [0], [0], [1], [0, 0, 1, 1], [], []>} : vector<16x32xf32>, vector<32x64xf32>, vector<16x64xf32> -> vector<16x64xf32>
    %c0_123 = arith.constant 0 : index
    %c0_124 = arith.constant 0 : index
    %219 = vector.load %arg12[%c0_123, %c0_124] : memref<1x64xf32, #tpu.memory_space<vmem>>, vector<1x64xf32>
    %220 = vector.broadcast %219 : vector<1x64xf32> to vector<16x64xf32>
    %221 = arith.addf %218, %220 : vector<16x64xf32>
    %cst_125 = arith.constant 5.000000e-01 : f32
    %222 = vector.broadcast %cst_125 : f32 to vector<16x64xf32>
    %223 = arith.mulf %222, %221 : vector<16x64xf32>
    %cst_126 = arith.constant 1.41421354 : f32
    %224 = vector.broadcast %cst_126 : f32 to vector<16x64xf32>
    %225 = arith.divf %221, %224 : vector<16x64xf32>
    %226 = math.erf %225 : vector<16x64xf32>
    %cst_127 = arith.constant 1.000000e+00 : f32
    %227 = vector.broadcast %cst_127 : f32 to vector<16x64xf32>
    %228 = arith.addf %227, %226 : vector<16x64xf32>
    %229 = arith.mulf %223, %228 : vector<16x64xf32>
    %c0_128 = arith.constant 0 : index
    %c0_129 = arith.constant 0 : index
    %230 = vector.load %arg13[%c0_128, %c0_129] : memref<64x32xf32, #tpu.memory_space<vmem>>, vector<64x32xf32>
    %cst_130 = arith.constant dense<0.000000e+00> : vector<16x32xf32>
    %231 = tpu.matmul %229, %230, %cst_130 {dimension_numbers = #tpu.dot_dimension_numbers<[1], [0], [0], [1], [0, 0, 1, 1], [], []>} : vector<16x64xf32>, vector<64x32xf32>, vector<16x32xf32> -> vector<16x32xf32>
    %c0_131 = arith.constant 0 : index
    %c0_132 = arith.constant 0 : index
    %232 = vector.load %arg14[%c0_131, %c0_132] : memref<1x32xf32, #tpu.memory_space<vmem>>, vector<1x32xf32>
    %233 = vector.broadcast %232 : vector<1x32xf32> to vector<16x32xf32>
    %234 = arith.addf %231, %233 : vector<16x32xf32>
    %235 = vector.extract_strided_slice %4 {offsets = [2, 0], sizes = [1, 32], strides = [1, 1]} : vector<3x32xf32> to vector<1x32xf32>
    %236 = vector.shape_cast %235 : vector<1x32xf32> to vector<32xf32>
    %237 = vector.shape_cast %236 : vector<32xf32> to vector<1x32xf32>
    %238 = vector.broadcast %237 : vector<1x32xf32> to vector<16x32xf32>
    %239 = arith.mulf %238, %234 : vector<16x32xf32>
    %240 = arith.addf %190, %239 : vector<16x32xf32>
    %241 = vector.shape_cast %240 : vector<16x32xf32> to vector<2x8x32xf32>
    %c0_133 = arith.constant 0 : index
    %c0_134 = arith.constant 0 : index
    %c0_135 = arith.constant 0 : index
    %242 = vector.load %arg28[%c0_133, %c0_134, %c0_135] : memref<2x8x32xf32, #tpu.memory_space<vmem>>, vector<2x8x32xf32>
    tpu.vector_store %arg28[%c0_133, %c0_134, %c0_135], %241 {strides = array<i32>} : memref<2x8x32xf32, #tpu.memory_space<vmem>>, vector<2x8x32xf32>,
    return
  }
  func.func @transform_0(%arg0: i32) -> (i32, i32, i32) {
    %c0_i32 = arith.constant 0 : i32
    %c0_i32_0 = arith.constant 0 : i32
    %c0_i32_1 = arith.constant 0 : i32
    %c0_i32_2 = arith.constant 0 : i32
    return %c0_i32, %c0_i32_0, %c0_i32_1 : i32, i32, i32
  }
  func.func @transform_1(%arg0: i32) -> (i32, i32, i32) {
    %c0_i32 = arith.constant 0 : i32
    %c0_i32_0 = arith.constant 0 : i32
    %c0_i32_1 = arith.constant 0 : i32
    %c0_i32_2 = arith.constant 0 : i32
    return %c0_i32, %c0_i32_0, %c0_i32_1 : i32, i32, i32
  }
  func.func @transform_2(%arg0: i32) -> (i32, i32, i32) {
    %c0_i32 = arith.constant 0 : i32
    %c0_i32_0 = arith.constant 0 : i32
    %c0_i32_1 = arith.constant 0 : i32
    %c0_i32_2 = arith.constant 0 : i32
    return %c0_i32, %c0_i32_0, %c0_i32_1 : i32, i32, i32
  }
  func.func @transform_3(%arg0: i32) -> (i32, i32, i32) {
    %c0_i32 = arith.constant 0 : i32
    %c0_i32_0 = arith.constant 0 : i32
    %c0_i32_1 = arith.constant 0 : i32
    %c0_i32_2 = arith.constant 0 : i32
    return %c0_i32, %c0_i32_0, %c0_i32_1 : i32, i32, i32
  }
  func.func @transform_4(%arg0: i32) -> (i32, i32, i32) {
    %c0_i32 = arith.constant 0 : i32
    %c0_i32_0 = arith.constant 0 : i32
    %c0_i32_1 = arith.constant 0 : i32
    %c0_i32_2 = arith.constant 0 : i32
    return %c0_i32, %c0_i32_0, %c0_i32_1 : i32, i32, i32
  }
  func.func @transform_5(%arg0: i32) -> (i32, i32, i32) {
    %c0_i32 = arith.constant 0 : i32
    %c0_i32_0 = arith.constant 0 : i32
    %c0_i32_1 = arith.constant 0 : i32
    %c0_i32_2 = arith.constant 0 : i32
    return %c0_i32, %c0_i32_0, %c0_i32_1 : i32, i32, i32
  }
  func.func @transform_6(%arg0: i32) -> (i32, i32, i32) {
    %c0_i32 = arith.constant 0 : i32
    %c0_i32_0 = arith.constant 0 : i32
    %c0_i32_1 = arith.constant 0 : i32
    %c0_i32_2 = arith.constant 0 : i32
    return %c0_i32, %c0_i32_0, %c0_i32_1 : i32, i32, i32
  }
  func.func @transform_7(%arg0: i32) -> (i32, i32) {
    %c0_i32 = arith.constant 0 : i32
    %c0_i32_0 = arith.constant 0 : i32
    %c0_i32_1 = arith.constant 0 : i32
    return %c0_i32, %c0_i32_0 : i32, i32
  }
  func.func @transform_8(%arg0: i32) -> (i32, i32) {
    %c0_i32 = arith.constant 0 : i32
    %c0_i32_0 = arith.constant 0 : i32
    %c0_i32_1 = arith.constant 0 : i32
    return %c0_i32, %c0_i32_0 : i32, i32
  }
  func.func @transform_9(%arg0: i32) -> (i32, i32) {
    %c0_i32 = arith.constant 0 : i32
    %c0_i32_0 = arith.constant 0 : i32
    %c0_i32_1 = arith.constant 0 : i32
    return %c0_i32, %c0_i32_0 : i32, i32
  }
  func.func @transform_10(%arg0: i32) -> (i32, i32) {
    %c0_i32 = arith.constant 0 : i32
    %c0_i32_0 = arith.constant 0 : i32
    %c0_i32_1 = arith.constant 0 : i32
    return %c0_i32, %c0_i32_0 : i32, i32
  }
  func.func @transform_11(%arg0: i32) -> (i32, i32) {
    %c0_i32 = arith.constant 0 : i32
    %c0_i32_0 = arith.constant 0 : i32
    %c0_i32_1 = arith.constant 0 : i32
    return %c0_i32, %c0_i32_0 : i32, i32
  }
  func.func @transform_12(%arg0: i32) -> (i32, i32) {
    %c0_i32 = arith.constant 0 : i32
    %c0_i32_0 = arith.constant 0 : i32
    %c0_i32_1 = arith.constant 0 : i32
    return %c0_i32, %c0_i32_0 : i32, i32
  }
  func.func @transform_13(%arg0: i32) -> (i32, i32) {
    %c0_i32 = arith.constant 0 : i32
    %c0_i32_0 = arith.constant 0 : i32
    %c0_i32_1 = arith.constant 0 : i32
    return %c0_i32, %c0_i32_0 : i32, i32
  }
  func.func @transform_14(%arg0: i32) -> (i32, i32) {
    %c0_i32 = arith.constant 0 : i32
    %c0_i32_0 = arith.constant 0 : i32
    %c0_i32_1 = arith.constant 0 : i32
    return %c0_i32, %c0_i32_0 : i32, i32
  }
  func.func @transform_15(%arg0: i32) -> (i32, i32) {
    %c0_i32 = arith.constant 0 : i32
    %c0_i32_0 = arith.constant 0 : i32
    %c0_i32_1 = arith.constant 0 : i32
    return %c0_i32, %c0_i32_0 : i32, i32
  }
  func.func @transform_16(%arg0: i32) -> (i32, i32) {
    %c0_i32 = arith.constant 0 : i32
    %c0_i32_0 = arith.constant 0 : i32
    %c0_i32_1 = arith.constant 0 : i32
    return %c0_i32, %c0_i32_0 : i32, i32
  }
  func.func @transform_17(%arg0: i32) -> (i32, i32) {
    %c0_i32 = arith.constant 0 : i32
    %c0_i32_0 = arith.constant 0 : i32
    %c0_i32_1 = arith.constant 0 : i32
    return %c0_i32, %c0_i32_0 : i32, i32
  }
  func.func @transform_18(%arg0: i32) -> (i32, i32) {
    %c0_i32 = arith.constant 0 : i32
    %c0_i32_0 = arith.constant 0 : i32
    %c0_i32_1 = arith.constant 0 : i32
    return %c0_i32, %c0_i32_0 : i32, i32
  }
  func.func @transform_19(%arg0: i32) -> (i32, i32) {
    %c0_i32 = arith.constant 0 : i32
    %c0_i32_0 = arith.constant 0 : i32
    %c0_i32_1 = arith.constant 0 : i32
    return %c0_i32, %c0_i32_0 : i32, i32
  }
  func.func @transform_20(%arg0: i32) -> (i32, i32) {
    %c0_i32 = arith.constant 0 : i32
    %c0_i32_0 = arith.constant 0 : i32
    %c0_i32_1 = arith.constant 0 : i32
    return %c0_i32, %c0_i32_0 : i32, i32
  }
  func.func @transform_21(%arg0: i32) -> (i32, i32) {
    %c0_i32 = arith.constant 0 : i32
    %c0_i32_0 = arith.constant 0 : i32
    %c0_i32_1 = arith.constant 0 : i32
    return %c0_i32, %c0_i32_0 : i32, i32
  }
  func.func @transform_22(%arg0: i32) -> (i32, i32) {
    %c0_i32 = arith.constant 0 : i32
    %c0_i32_0 = arith.constant 0 : i32
    %c0_i32_1 = arith.constant 0 : i32
    return %c0_i32, %c0_i32_0 : i32, i32
  }
  func.func @transform_23(%arg0: i32) -> (i32, i32) {
    %c0_i32 = arith.constant 0 : i32
    %c0_i32_0 = arith.constant 0 : i32
    %c0_i32_1 = arith.constant 0 : i32
    return %c0_i32, %c0_i32_0 : i32, i32
  }
  func.func @transform_24(%arg0: i32) -> (i32, i32) {
    %c0_i32 = arith.constant 0 : i32
    %c0_i32_0 = arith.constant 0 : i32
    %c0_i32_1 = arith.constant 0 : i32
    return %c0_i32, %c0_i32_0 : i32, i32
  }
  func.func @transform_25(%arg0: i32) -> (i32, i32) {
    %c0_i32 = arith.constant 0 : i32
    %c0_i32_0 = arith.constant 0 : i32
    %c0_i32_1 = arith.constant 0 : i32
    return %c0_i32, %c0_i32_0 : i32, i32
  }
  func.func @transform_26(%arg0: i32) -> (i32, i32) {
    %c0_i32 = arith.constant 0 : i32
    %c0_i32_0 = arith.constant 0 : i32
    %c0_i32_1 = arith.constant 0 : i32
    return %c0_i32, %c0_i32_0 : i32, i32
  }
  func.func @transform_27(%arg0: i32) -> (i32, i32, i32) {
    %c0_i32 = arith.constant 0 : i32
    %c0_i32_0 = arith.constant 0 : i32
    %c0_i32_1 = arith.constant 0 : i32
    %c0_i32_2 = arith.constant 0 : i32
    return %c0_i32, %c0_i32_0, %c0_i32_1 : i32, i32, i32
  }
}

</mosaic_0001>

<bundles_post_ra>
// kernel: tpu_custom_call.1
= control target key start
LH: loop header
LB: loop body
LE: loop exit
PB: predicated region body
PF: predicated region fallthrough
CT: control target
= control target key end

     0   :  { %s2769_s0 = inlined_call_operand.vmem [shape: f32[2,8,32], index: 0, kind: input, shape index: {}]   ;;  %s2770_s1 = inlined_call_operand.vmem [shape: f32[2,8,32], index: 1, kind: input, shape index: {}]   ;;  %s2771_s2 = inlined_call_operand.vmem [shape: f32[2,8,32], index: 2, kind: input, shape index: {}]   ;;  %s2772_s3 = inlined_call_operand.vmem [shape: f32[2,8,32], index: 3, kind: input, shape index: {}]   ;;  %s2773_s4 = inlined_call_operand.vmem [shape: f32[8,32,32], index: 4, kind: input, shape index: {}]   ;;  %s2774_s5 = inlined_call_operand.vmem [shape: f32[6,1,32], index: 5, kind: input, shape index: {}]   ;;  %s2775_s6 = inlined_call_operand.vmem [shape: f32[2,32,1], index: 6, kind: input, shape index: {}]   ;;  %s2776_s7 = inlined_call_operand.vmem [shape: f32[32,3], index: 7, kind: input, shape index: {}]   ;;  %s2777_s8 = inlined_call_operand.vmem [shape: f32[1,3], index: 8, kind: input, shape index: {}]   ;;  %s2778_s9 = inlined_call_operand.vmem [shape: f32[3,192], index: 9, kind: input, shape index: {}]   ;;  %s2779_s10 = inlined_call_operand.vmem [shape: f32[32,64], index: 10, kind: input, shape index: {}]   ;;  %s2780_s11 = inlined_call_operand.vmem [shape: f32[1,64], index: 11, kind: input, shape index: {}]   ;;  %s2781_s12 = inlined_call_operand.vmem [shape: f32[64,32], index: 12, kind: input, shape index: {}]   ;;  %s2782_s13 = inlined_call_operand.vmem [shape: f32[1,32], index: 13, kind: input, shape index: {}]   ;;  %s2783_s14 = inlined_call_operand.vmem [shape: f32[3,32], index: 14, kind: input, shape index: {}]   ;;  %s2784_s15 = inlined_call_operand.vmem [shape: f32[3,32], index: 15, kind: input, shape index: {}]   ;;  %s2785_s16 = inlined_call_operand.vmem [shape: f32[3,32], index: 16, kind: input, shape index: {}]   ;;  %s2786_s17 = inlined_call_operand.vmem [shape: f32[16,64], index: 17, kind: input, shape index: {}]   ;;  %s2787_s18 = inlined_call_operand.vmem [shape: f32[16,192], index: 18, kind: input, shape index: {}]   ;;  %s2788_s19 = inlined_call_operand.vmem [shape: f32[32,64], index: 19, kind: input, shape index: {}]   ;;  %s2789_s20 = inlined_call_operand.vmem [shape: f32[32,192], index: 20, kind: input, shape index: {}]   ;;  %s2790_s21 = inlined_call_operand.vmem [shape: f32[64,32], index: 21, kind: input, shape index: {}]   ;;  %s2791_s22 = inlined_call_operand.vmem [shape: f32[192,32], index: 22, kind: input, shape index: {}]   ;;  %s2792_s23 = inlined_call_operand.vmem [shape: f32[64,4], index: 23, kind: input, shape index: {}]   ;;  %s2793_s24 = inlined_call_operand.vmem [shape: f32[4,64], index: 24, kind: input, shape index: {}]   ;;  %s2794_s25 = inlined_call_operand.vmem [shape: f32[192,12], index: 25, kind: input, shape index: {}]   ;;  %s2795_s26 = inlined_call_operand.vmem [shape: f32[12,192], index: 26, kind: input, shape index: {}]   ;;  %s2796_s27 = inlined_call_operand.hbm [shape: f32[2,8,32], index: 27, kind: output, shape index: {}]  }
   0x1   :  { %2806 = sst [smem:[#allocation5_spill]] %s2769_s0 }
   0x2   :  { %2807 = sst [smem:[#allocation6_spill]] %s2770_s1 }
   0x3   :  { %2808 = sst [smem:[#allocation7_spill]] %s2771_s2 }
   0x4   :  { %2809 = sst [smem:[#allocation8_spill]] %s2772_s3 }
   0x5   :  { %2810 = sst [smem:[#allocation9_spill]] %s2773_s4 }
   0x6   :  { %2811 = sst [smem:[#allocation10_spill]] %s2774_s5 }
   0x7   :  { %2812 = sst [smem:[#allocation11_spill]] %s2775_s6 }
   0x8   :  { %2813 = sst [smem:[#allocation12_spill]] %s2776_s7 }
   0x9   :  { %2814 = sst [smem:[#allocation13_spill]] %s2777_s8 }
   0xa   :  { %2815 = sst [smem:[#allocation14_spill]] %s2778_s9 }
   0xb   :  { %2816 = sst [smem:[#allocation15_spill]] %s2779_s10 }
   0xc   :  { %2817 = sst [smem:[#allocation16_spill]] %s2780_s11 }
   0xd   :  { %s2818_s8 = sld [smem:[#allocation5_spill]]  ;;  %vm92_vm0 = vcmask 261120  }
  0x13   :  { %v1980_v0 = vld [vmem:[%s2818_s8 + $0x8] sm:$0xff]  ;;  %v1987_v2 = vld [vmem:[%s2818_s8] sm:$0xff] }
  0x14   :  { %v96_v1 = vsel %vm92_vm0, %v1980_v0, 0.0 }
  0x15   :  { %97 = vadd.xlane.f32.xlu0 %v96_v1 }
  0x16   :  { %32 = vsyncpa [#allocation3], 0  ;;  %v93_v3 = vsel %vm92_vm0, %v1987_v2, 0.0  ;;  %v1827_v4 = vmov 32.0   ;;  %s2819_s0 = sld [smem:[#allocation9_spill]]  ;;  %v1828_v40 = vmov 0  }
  0x17   :  { %1750 = vrcp.f32 %v1827_v4  ;;  %s2820_s1 = sld [smem:[#allocation11_spill]]  ;;  %1740 = vset.pattern.permute.xlu1 %v1828_v40  ;;  %1739 = vset.pattern.permute.xlu0 %v1828_v40  ;;  %v2035_v42 = vld [vmem:[%s2783_s14] sm:$0x7]  ;;  %s1829_s4 = smov 16   ;;  %vm353_vm8 = vcmask 130048   ;;  %vm362_vm9 = vcmask 392192  }
  0x18   :  { %1738 = vset.pattern.permute.xlu2 %v1828_v40  ;;  %v2040_v46 = vld [vmem:[%s2784_s15] sm:$0x7]  ;;  %v144_v47 = vperm.slane %v2035_v42, 0  ;;  %s1830_s8 = smov 32   ;;  %s1831_s30 = smov 48   ;;  %vm408_vm10 = vcmask 523264  }
  0x19   :  { %v147_v51 = vperm.slane %v2040_v46, 0  ;;  %s2821_s3 = sld [smem:[#allocation10_spill]]  ;;  %vm459_vm11 = vcmask 1043456   ;;  %vm452_vm12 = vcmask 31744   ;;  %s1832_s11 = smov 96  }
  0x1a   :  { %s2824_s28 = sld [smem:[#allocation7_spill]] }
  0x1b   :  { %s2825_s6 = sld [smem:[#allocation6_spill]] }
  0x1c   :  { %v153_v21 = vld [vmem:[%s2819_s0 + $0x18] sm:$0xff]  ;;  %v152_v23 = vld [vmem:[%s2819_s0 + $0x10] sm:$0xff]  ;;  %v151_v25 = vld [vmem:[%s2819_s0 + $0x8] sm:$0xff]  ;;  %s2826_s10 = sld [smem:[#allocation14_spill]] }
  0x1d   :  { %94 = vadd.xlane.f32.xlu0 %v93_v3  ;;  %v1751_v5 = vpop.eup %1750  ;;  %v1623_v22 = vld [vmem:[%s2819_s0 + $0x58] sm:$0xff]  ;;  %215 = vmatpush.msra.mxu0 %v153_v21  ;;  %v1622_v24 = vld [vmem:[%s2819_s0 + $0x50] sm:$0xff]  ;;  %v1621_v26 = vld [vmem:[%s2819_s0 + $0x48] sm:$0xff]  ;;  %s2828_s2 = sld [smem:[#allocation15_spill]] }
  0x1e   :  { %v100_v6 = vmul.f32 32.0, %v1751_v5  ;;  %vm104_vm1 = vweird.f32 %v1751_v5  ;;  %302 = vmatpush.msra.mxu2 %v1623_v22  ;;  %v150_v29 = vld [vmem:[%s2819_s0] sm:$0xff]  ;;  %v161_v53 = vld [vmem:[%s2820_s1 + $0x8] sm:$0xff]  ;;  %v163_v60 = vld [vmem:[%s2820_s1 + $0x18] sm:$0xff]  ;;  %s2829_s29 = sld [smem:[#allocation16_spill]] }
  0x1f   :  { %216 = vmatpush.msra.mxu0 %v152_v23  ;;  %v1620_v30 = vld [vmem:[%s2819_s0 + $0x40] sm:$0xff]  ;;  %243 = vperm.xlu2 %1738, %v163_v60   ;;  %v162_v1 = vld [vmem:[%s2820_s1 + $0x10] sm:$0xff]  ;;  %v1617_v3 = vld [vmem:[%s2819_s0 + $0x28] sm:$0xff] }
  0x20   :  { %v101_v7 = vsub.f32 1.0, %v100_v6  ;;  %303 = vmatpush.msra.mxu2 %v1622_v24  ;;  %v160_v39 = vld [vmem:[%s2820_s1] sm:$0xff]  ;;  %v1618_v4 = vld [vmem:[%s2819_s0 + $0x30] sm:$0xff] }
  0x21   :  { %217 = vmatpush.msra.mxu0 %v151_v25  ;;  %v1616_v63 = vld [vmem:[%s2819_s0 + $0x20] sm:$0xff] }
  0x22   :  { %v102_v8 = vmul.f32 %v1751_v5, %v101_v7  ;;  %304 = vmatpush.msra.mxu2 %v1621_v26  ;;  %v176_v26 = vld [vmem:[%s2788_s19 + $0x18] sm:$0xff] }
  0x23   :  { %218 = vmatpush.msra.mxu0 %v150_v29 }
  0x24   :  { %v103_v9 = vadd.f32 %v1751_v5, %v102_v8  ;;  %305 = vmatpush.msra.mxu2 %v1620_v30 }
  0x26   :  { %v1991_v10 = vsel %vm104_vm1, %v1751_v5, %v103_v9  ;;  %v1619_v5 = vld [vmem:[%s2819_s0 + $0x38] sm:$0xff] }
  0x27   :  { %238 = vperm.xlu2 %1738, %v162_v1   ;;  %v182_v1 = vld [vmem:[%s2790_s21 + $0x28] sm:$0xff] }
  0x31   :  { %233 = vperm.xlu0 %1739, %v161_v53  }
  0x79   :  { %v244_v9 = vpop.permute.xlu2 %243 }
  0x88   :  { %v98_v11 = vpop.xlane.xlu0 %97 }
  0x89   :  { %v107_v12 = vmul.f32 %v1991_v10, %v98_v11 }
  0x8b   :  { %v109_v13 = vsub.f32 %v1980_v0, %v107_v12 }
  0x8d   :  { %v111_v14 = vmul.f32 %v109_v13, %v109_v13 }
  0x8f   :  { %v115_v15 = vsel %vm92_vm0, %v111_v14, 0.0  ;;  %v239_v14 = vpop.permute.xlu2 %238 }
  0x90   :  { %116 = vadd.xlane.f32.xlu1 %v115_v15  ;;  %v95_v16 = vpop.xlane.xlu0 %94 }
  0x91   :  { %v106_v17 = vmul.f32 %v1991_v10, %v95_v16 }
  0x93   :  { %v1998_v18 = vsub.f32 %v1987_v2, %v106_v17 }
  0x95   :  { %v110_v19 = vmul.f32 %v1998_v18, %v1998_v18 }
  0x97   :  { %v112_v20 = vsel %vm92_vm0, %v110_v19, 0.0 }
  0x98   :  { %113 = vadd.xlane.f32.xlu1 %v112_v20 }
  0xa3   :  { %v234_v11 = vpop.permute.xlu0 %233 }
  0xb1   :  { %228 = vperm.xlu1 %1740, %v160_v39  }
 0x103   :  { %v117_v27 = vpop.xlane.xlu1 %116 }
 0x104   :  { %v119_v28 = vmul.f32 %v117_v27, %v1991_v10 }
 0x106   :  { %v121_v31 = vadd.f32 1e-05, %v119_v28 }
 0x108   :  { %1752 = vrsqrt.f32 %v121_v31  ;;  %vm138_vm3 = vweird.f32 %v121_v31 }
 0x10b   :  { %v114_v32 = vpop.xlane.xlu1 %113 }
 0x10c   :  { %v118_v33 = vmul.f32 %v114_v32, %v1991_v10 }
 0x10e   :  { %v1753_v34 = vpop.eup %1752  ;;  %v120_v35 = vadd.f32 1e-05, %v118_v33 }
 0x10f   :  { %v133_v36 = vmul.f32 %v1753_v34, %v121_v31  ;;  %vm139_vm2 = vweird.f32 %v1753_v34 }
 0x110   :  { %1754 = vrsqrt.f32 %v120_v35  ;;  %vm140_vm4 = vmor %vm138_vm3, %vm139_vm2  ;;  %vm128_vm6 = vweird.f32 %v120_v35 }
 0x111   :  { %v134_v37 = vmul.f32 %v1753_v34, %v133_v36 }
 0x113   :  { %v135_v38 = vmul.f32 0.5, %v134_v37 }
 0x115   :  { %v136_v41 = vsub.f32 1.5, %v135_v38 }
 0x116   :  { %v1755_v43 = vpop.eup %1754 }
 0x117   :  { %v137_v44 = vmul.f32 %v1753_v34, %v136_v41  ;;  %v123_v45 = vmul.f32 %v1755_v43, %v120_v35  ;;  %vm129_vm5 = vweird.f32 %v1755_v43 }
 0x118   :  { %vm130_vm7 = vmor %vm128_vm6, %vm129_vm5 }
 0x119   :  { %v141_v48 = vsel %vm140_vm4, %v1753_v34, %v137_v44  ;;  %v124_v49 = vmul.f32 %v1755_v43, %v123_v45  ;;  %v175_v34 = vld [vmem:[%s2788_s19 + $0x10] sm:$0xff]  ;;  %v174_v45 = vld [vmem:[%s2788_s19 + $0x8] sm:$0xff]  ;;  %vm704_vm4 = vcmask 1042432  }
 0x11a   :  { %v143_v50 = vmul.f32 %v141_v48, %v109_v13  ;;  %v1742_v48 = vld [vmem:[%s2821_s3 + $0x1] ss:$0 sm:$0xff] }
 0x11b   :  { %v125_v52 = vmul.f32 0.5, %v124_v49 }
 0x11c   :  { %v146_v54 = vmul.f32 %v144_v47, %v143_v50 }
 0x11d   :  { %v126_v55 = vsub.f32 1.5, %v125_v52  ;;  %v1741_v52 = vld [vmem:[%s2821_s3] ss:$0 sm:$0xff] }
 0x11e   :  { %v149_v56 = vadd.f32 %v147_v51, %v146_v54 }
 0x11f   :  { %v127_v57 = vmul.f32 %v1755_v43, %v126_v55  ;;  %v173_v55 = vld [vmem:[%s2788_s19] sm:$0xff] }
 0x120   :  { %1627 = vmatpush.xpose.msk.msra.mxu1 %vm92_vm0, %v149_v56 }
 0x121   :  { %v131_v58 = vsel %vm130_vm7, %v1755_v43, %v127_v57 }
 0x122   :  { %v142_v59 = vmul.f32 %v131_v58, %v1998_v18  ;;  %v184_v58 = vld [vmem:[%s2790_s21 + $0x38] sm:$0xff] }
 0x123   :  { %v229_v6 = vpop.permute.xlu1 %228 }
 0x124   :  { %v145_v61 = vmul.f32 %v144_v47, %v142_v59 }
 0x126   :  { %v148_v62 = vadd.f32 %v147_v51, %v145_v61 }
 0x128   :  { %1625 = vmatmul.msk.f32.vlgmr.msra.gmra.mxu0 %vm92_vm0, %v148_v62  ;;  %1628 = vmatpush.xpose.msk.msra.mxu1 %vm92_vm0, %v148_v62 }
 0x129   :  { %1633 = vmatmul.msk.f32.vlgmr.msra.gmra.mxu2 %vm92_vm0, %v148_v62  ;;  %v183_v62 = vld [vmem:[%s2790_s21 + $0x30] sm:$0xff] }
 0x12b   :  { %1629 = vmatmul.msk.f32.vlgmr.msra.gmra.mxu1 %vm92_vm0, %v1616_v63 }
 0x130   :  { %1626 = vmatmul.msk.f32.gmra.mxu0 %vm92_vm0, %v149_v56 }
 0x131   :  { %1634 = vmatmul.msk.f32.gmra.mxu2 %vm92_vm0, %v149_v56 }
 0x133   :  { %1630 = vmatmul.msk.f32.gmra.mxu1 %vm92_vm0, %v1617_v3 }
 0x13b   :  { %1631 = vmatmul.msk.f32.gmra.mxu1 %vm92_vm0, %v1618_v4  ;;  %v181_v4 = vld [vmem:[%s2790_s21 + $0x20] sm:$0xff] }
 0x143   :  { %1632 = vmatmul.msk.f32.gmra.mxu1 %vm92_vm0, %v1619_v5 }
 0x1a5   :  { %v220_v47 = vpop.f32.mrf.mxu0 }
 0x1a6   :  { %v221_v61 = vadd.f32 %v1741_v52, %v220_v47 }
 0x1a8   :  { %v275_v7 = vpop.f32.mrf.mxu1 }
 0x1a9   :  { %v276_v8 = vadd.f32 %v275_v7, %v229_v6  ;;  %v180_v7 = vld [vmem:[%s2790_s21 + $0x18] sm:$0xff] }
 0x1ab   :  { %317 = vrot.lane.b32.xlu2 %v276_v8, %s1829_s4 }
 0x1ac   :  { %v307_v32 = vpop.f32.mrf.mxu2 }
 0x1ad   :  { %v308_v59 = vadd.f32 %v1742_v48, %v307_v32  ;;  %v223_v5 = vpop.f32.mrf.mxu0  ;;  %v186_v32 = vld [vmem:[%s2792_s23 + $0x8] sm:$0xff] }
 0x1af   :  { %v377_v3 = vmul.f32 %v308_v59, %v183_v62 }
 0x1b0   :  { %v278_v12 = vpop.f32.mrf.mxu1 }
 0x1b1   :  { %v279_v13 = vadd.f32 %v278_v12, %v234_v11  ;;  %v179_v11 = vld [vmem:[%s2790_s21 + $0x10] sm:$0xff] }
 0x1b3   :  { %331 = vrot.lane.b32.xlu0 %v279_v13, %s1830_s8  ;;  %319 = vrot.lane.b32.xlu2 %v279_v13, %s1829_s4 }
 0x1b4   :  { %v310_v41 = vpop.f32.mrf.mxu2 }
 0x1b5   :  { %v311_v56 = vadd.f32 %v1742_v48, %v310_v41 }
 0x1b7   :  { %v378_v63 = vmul.f32 %v311_v56, %v184_v58  ;;  %v376_v6 = vmul.f32 %v311_v56, %v182_v1  ;;  %v374_v12 = vmul.f32 %v311_v56, %v180_v7 }
 0x1b8   :  { %v281_v15 = vpop.f32.mrf.mxu1 }
 0x1b9   :  { %v282_v16 = vadd.f32 %v281_v15, %v239_v14  ;;  %v373_v14 = vmul.f32 %v308_v59, %v179_v11  ;;  %v177_v15 = vld [vmem:[%s2790_s21] sm:$0xff]  ;;  %v1673_v11 = vld [vmem:[%s2820_s1 + $0x38] sm:$0xff] }
 0x1bb   :  { %333 = vrot.lane.b32.xlu1 %v282_v16, %s1830_s8  ;;  %329 = vrot.lane.b32.xlu0 %v276_v8, %s1830_s8 }
 0x1bc   :  { %321 = vrot.lane.b32.xlu2 %v282_v16, %s1829_s4 }
 0x1c0   :  { %v284_v17 = vpop.f32.mrf.mxu1 }
 0x1c1   :  { %v285_v18 = vadd.f32 %v284_v17, %v244_v9  ;;  %v224_v9 = vadd.f32 %v1741_v52, %v223_v5  ;;  %v371_v17 = vmul.f32 %v308_v59, %v177_v15 }
 0x1c3   :  { %345 = vrot.lane.b32.xlu1 %v282_v16, %s1831_s30 }
 0x1c4   :  { %323 = vrot.lane.b32.xlu2 %v285_v18, %s1829_s4 }
 0x1cb   :  { %343 = vrot.lane.b32.xlu1 %v279_v13, %s1831_s30 }
 0x1cc   :  { %335 = vrot.lane.b32.xlu2 %v285_v18, %s1830_s8  ;;  %s2823_s8 = sld [smem:[#allocation8_spill]] }
 0x1d4   :  { %347 = vrot.lane.b32.xlu2 %v285_v18, %s1831_s30 }
 0x1dc   :  { %341 = vrot.lane.b32.xlu2 %v276_v8, %s1831_s30 }
 0x205   :  { %v318_v19 = vpop.permute.xlu2 %317 }
 0x206   :  { %v354_v43 = vsel %vm353_vm8, %v276_v8, %v318_v19  ;;  %v375_v8 = vmul.f32 %v308_v59, %v181_v4  ;;  %v191_v19 = vld [vmem:[%s2792_s23 + $0x30] sm:$0xff]  ;;  %v2197_v59 = vld [vmem:[%s2785_s16] sm:$0x7] }
 0x20d   :  { %v320_v20 = vpop.permute.xlu2 %319 }
 0x20e   :  { %v355_v44 = vsel %vm353_vm8, %v279_v13, %v320_v20  ;;  %v178_v13 = vld [vmem:[%s2790_s21 + $0x8] sm:$0xff]  ;;  %v171_v20 = vld [vmem:[%s2786_s17] sm:$0xff]  ;;  %s1834_s21 = smov [#allocation2]  }
 0x216   :  { %v322_v21 = vpop.permute.xlu2 %321 }
 0x217   :  { %v356_v33 = vsel %vm353_vm8, %v282_v16, %v322_v21  ;;  %v372_v16 = vmul.f32 %v311_v56, %v178_v13  ;;  %v1644_v56 = vld [vmem:[%s2819_s0 + $0x60] sm:$0xff] }
 0x21e   :  { %v324_v22 = vpop.permute.xlu2 %323 }
 0x21f   :  { %v357_v24 = vsel %vm353_vm8, %v285_v18, %v324_v22  ;;  %v192_v18 = vld [vmem:[%s2792_s23 + $0x38] sm:$0xff] }
 0x220   :  { %435 = vmatpush.msrb.mxu0 %v192_v18 }
 0x222   :  { %436 = vmatpush.msrb.mxu0 %v191_v19 }
 0x225   :  { %v332_v30 = vpop.permute.xlu0 %331 }
 0x226   :  { %v336_v23 = vpop.permute.xlu2 %335  ;;  %v359_v49 = vsel %vm92_vm0, %v355_v44, %v332_v30  ;;  %v188_v30 = vld [vmem:[%s2792_s23 + $0x18] sm:$0xff] }
 0x227   :  { %v361_v27 = vsel %vm92_vm0, %v357_v24, %v336_v23  ;;  %v172_v24 = vld [vmem:[%s2786_s17 + $0x8] sm:$0xff]  ;;  %s2822_s17 = sld [smem:[#allocation12_spill]] }
 0x22d   :  { %v334_v25 = vpop.permute.xlu1 %333  ;;  %v330_v39 = vpop.permute.xlu0 %329 }
 0x22e   :  { %v348_v28 = vpop.permute.xlu2 %347  ;;  %v360_v35 = vsel %vm92_vm0, %v356_v33, %v334_v25  ;;  %v358_v50 = vsel %vm92_vm0, %v354_v43, %v330_v39  ;;  %v185_v33 = vld [vmem:[%s2792_s23] sm:$0xff] }
 0x22f   :  { %v366_v29 = vsel %vm362_vm9, %v361_v27, %v348_v28  ;;  %v190_v28 = vld [vmem:[%s2792_s23 + $0x28] sm:$0xff]  ;;  %v193_v43 = vld [vmem:[%s2793_s24] sm:$0xf] }
 0x230   :  { %v370_v31 = vmul.f32 %v366_v29, %v176_v26  ;;  %437 = vmatpush.msrb.mxu0 %v190_v28  ;;  %v189_v29 = vld [vmem:[%s2792_s23 + $0x20] sm:$0xff]  ;;  %1639 = vmatpush.msk.msrb.mxu2 %vm459_vm11, %v193_v43  ;;  %v1662_v28 = vld [vmem:[%s2819_s0 + $0x88] sm:$0xff] }
 0x232   :  { %397 = vmatpush.msra.mxu3 %v370_v31  ;;  %438 = vmatpush.msrb.mxu0 %v189_v29  ;;  %v187_v31 = vld [vmem:[%s2792_s23 + $0x10] sm:$0xff]  ;;  %v617_v29 = vld [vmem:[%s2822_s17] sm:$0xff]  ;;  %s1836_s23 = smov 8  }
 0x234   :  { %439 = vmatpush.msrb.mxu0 %v188_v30  ;;  %v1661_v30 = vld [vmem:[%s2819_s0 + $0x80] sm:$0xff] }
 0x235   :  { %v346_v36 = vpop.permute.xlu1 %345 }
 0x236   :  { %v365_v37 = vsel %vm362_vm9, %v360_v35, %v346_v36  ;;  %v342_v40 = vpop.permute.xlu2 %341  ;;  %440 = vmatpush.msrb.mxu0 %v187_v31  ;;  %v2262_v31 = vld [vmem:[%s2823_s8 + $0x8] sm:$0xff] }
 0x237   :  { %v369_v38 = vmul.f32 %v365_v37, %v175_v34  ;;  %v363_v53 = vsel %vm362_vm9, %v358_v50, %v342_v40  ;;  %v1646_v50 = vld [vmem:[%s2819_s0 + $0x70] sm:$0xff] }
 0x238   :  { %v367_v60 = vmul.f32 %v363_v53, %v173_v55  ;;  %441 = vmatpush.msrb.mxu0 %v186_v32 }
 0x239   :  { %398 = vmatpush.msra.mxu3 %v369_v38 }
 0x23a   :  { %442 = vmatpush.msrb.mxu0 %v185_v33  ;;  %v2269_v33 = vld [vmem:[%s2823_s8] sm:$0xff] }
 0x23d   :  { %v344_v51 = vpop.permute.xlu1 %343 }
 0x23e   :  { %v364_v54 = vsel %vm362_vm9, %v359_v49, %v344_v51  ;;  %v1647_v49 = vld [vmem:[%s2819_s0 + $0x78] sm:$0xff]  ;;  %v1645_v51 = vld [vmem:[%s2819_s0 + $0x68] sm:$0xff] }
 0x23f   :  { %v368_v57 = vmul.f32 %v364_v54, %v174_v45  ;;  %545 = vmatpush.msra.mxu0 %v1647_v49 }
 0x241   :  { %399 = vmatpush.msra.mxu3 %v368_v57  ;;  %546 = vmatpush.msra.mxu0 %v1646_v50 }
 0x243   :  { %400 = vmatpush.msra.mxu3 %v367_v60  ;;  %547 = vmatpush.msra.mxu0 %v1645_v51  ;;  %v1743_v60 = vld [vmem:[%s2821_s3 + $0x2] ss:$0 sm:$0xff] }
 0x244   :  { %1635 = vmatmul.msk.f32.vlgmr.msra.gmra.mxu3 %vm92_vm0, %v221_v61  ;;  %v556_v61 = vperm.slane %v2197_v59, 0 }
 0x245   :  { %502 = vmatpush.msrb.mxu3 %v378_v63  ;;  %548 = vmatpush.msra.mxu0 %v1644_v56 }
 0x247   :  { %503 = vmatpush.msrb.mxu3 %v377_v3 }
 0x249   :  { %504 = vmatpush.msrb.mxu3 %v376_v6 }
 0x24b   :  { %505 = vmatpush.msrb.mxu3 %v375_v8 }
 0x24c   :  { %1636 = vmatmul.msk.f32.gmra.mxu3 %vm92_vm0, %v224_v9 }
 0x24d   :  { %506 = vmatpush.msrb.mxu3 %v374_v12 }
 0x24f   :  { %507 = vmatpush.msrb.mxu3 %v373_v14 }
 0x251   :  { %508 = vmatpush.msrb.mxu3 %v372_v16 }
 0x253   :  { %509 = vmatpush.msrb.mxu3 %v371_v17 }
 0x255   :  { %1724 = vmatpush.msra.mxu3 %v1647_v49 }
 0x257   :  { %1725 = vmatpush.msra.mxu3 %v1646_v50 }
 0x259   :  { %1726 = vmatpush.msra.mxu3 %v1645_v51  ;;  %v605_v51 = vperm.slane %v2035_v42, 1 }
 0x25b   :  { %1727 = vmatpush.msra.mxu3 %v1644_v56 }
 0x2c7   :  { %v402_v21 = vpop.f32.mrf.mxu3 }
 0x2c8   :  { %v403_v22 = vadd.f32 %v402_v21, %v171_v20  ;;  %v1672_v21 = vld [vmem:[%s2820_s1 + $0x30] sm:$0xff] }
 0x2ca   :  { %v409_v23 = vsel %vm408_vm10, %v403_v22, -inf }
 0x2cb   :  { %410 = vmax.xlane.f32.xlu1 %v409_v23  ;;  %v620_v23 = vld [vmem:[%s2822_s17 + $0x18] sm:$0xff] }
 0x2cc   :  { %643 = vmatpush.msrb.mxu1 %v620_v23 }
 0x2cf   :  { %v405_v25 = vpop.f32.mrf.mxu3 }
 0x2d0   :  { %v406_v26 = vadd.f32 %v405_v25, %v172_v24  ;;  %v1664_v24 = vld [vmem:[%s2819_s0 + $0x98] sm:$0xff]  ;;  %v619_v25 = vld [vmem:[%s2822_s17 + $0x10] sm:$0xff] }
 0x2d1   :  { %644 = vmatpush.msrb.mxu1 %v619_v25 }
 0x2d2   :  { %v412_v27 = vsel %vm408_vm10, %v406_v26, -inf }
 0x2d3   :  { %413 = vmax.xlane.f32.xlu0 %v412_v27  ;;  %v618_v27 = vld [vmem:[%s2822_s17 + $0x8] sm:$0xff] }
 0x2d4   :  { %645 = vmatpush.msrb.mxu1 %v618_v27 }
 0x2d6   :  { %646 = vmatpush.msrb.mxu1 %v617_v29 }
 0x2d8   :  { %1681 = vmatpush.xpose.msk.msra.mxu1 %vm92_vm0, %v2262_v31 }
 0x2dc   :  { %1682 = vmatpush.xpose.msk.msra.mxu1 %vm92_vm0, %v2269_v33 }
 0x33e   :  { %v411_v34 = vpop.xlane.xlu1 %410 }
 0x33f   :  { %v415_v35 = vsub.f32 %v403_v22, %v411_v34  ;;  %v1671_v22 = vld [vmem:[%s2820_s1 + $0x28] sm:$0xff] }
 0x341   :  { %v417_v36 = vmul.f32 1.442695, %v415_v35 }
 0x343   :  { %1756 = vpow2.f32 %v417_v36  ;;  %v2277_v36 = vld [vmem:[%s2824_s28 + $0x8] sm:$0xff] }
 0x344   :  { %1683 = vmatpush.xpose.msk.msra.mxu1 %vm92_vm0, %v2277_v36 }
 0x346   :  { %v414_v37 = vpop.xlane.xlu0 %413 }
 0x347   :  { %v416_v38 = vsub.f32 %v406_v26, %v414_v37  ;;  %v1663_v26 = vld [vmem:[%s2819_s0 + $0x90] sm:$0xff]  ;;  %v2284_v37 = vld [vmem:[%s2824_s28] sm:$0xff]  ;;  %s1602_s28 = sshll.u32 %s1834_s21, 4  ;;  %s1603_s28 = int_to_ptr.vmem [resolvable:$true] %s1602_s28 }
 0x348   :  { %1684 = vmatpush.xpose.msk.msra.mxu1 %vm92_vm0, %v2284_v37 }
 0x349   :  { %v1757_v39 = vpop.eup %1756  ;;  %v419_v40 = vmul.f32 1.442695, %v416_v38 }
 0x34a   :  { %1637 = vmatmul.msk.f32.vlgmr.msrb.gmra.mxu0 %vm408_vm10, %v1757_v39 }
 0x34b   :  { %1758 = vpow2.f32 %v419_v40  ;;  %858 = vmatpush.msrb.mxu0 %v1664_v24 }
 0x34d   :  { %859 = vmatpush.msrb.mxu0 %v1663_v26 }
 0x34f   :  { %860 = vmatpush.msrb.mxu0 %v1662_v28 }
 0x351   :  { %v1759_v41 = vpop.eup %1758  ;;  %861 = vmatpush.msrb.mxu0 %v1661_v30 }
 0x352   :  { %1638 = vmatmul.msk.f32.gmra.mxu0 %vm408_vm10, %v1759_v41 }
 0x3c7   :  { %v444_v44 = vpop.f32.mrf.mxu0 }
 0x3c8   :  { %1760 = vrcp.f32 %v444_v44  ;;  %v2298_v44 = vld [vmem:[%s2825_s6] sm:$0xff] }
 0x3ce   :  { %v1761_v45 = vpop.eup %1760 }
 0x3cf   :  { %v447_v47 = vpop.f32.mrf.mxu0  ;;  %1640 = vmatmul.msk.f32.vlgmr.msrb.gmra.mxu2 %vm452_vm12, %v1761_v45 }
 0x3d0   :  { %1762 = vrcp.f32 %v447_v47 }
 0x3d6   :  { %v1763_v48 = vpop.eup %1762 }
 0x3d7   :  { %1641 = vmatmul.msk.f32.gmra.mxu2 %vm452_vm12, %v1763_v48  ;;  %vm697_vm12 = vcmask 23552  }
 0x452   :  { %v480_v52 = vpop.f32.mrf.mxu2 }
 0x453   :  { %v486_v53 = vmul.f32 %v1757_v39, %v480_v52  ;;  %v2291_v39 = vld [vmem:[%s2825_s6 + $0x8] sm:$0xff]  ;;  %s2827_s6 = sld [smem:[#allocation13_spill]] }
 0x454   :  { %1685 = vmatpush.xpose.msk.msra.mxu1 %vm92_vm0, %v2291_v39 }
 0x455   :  { %1642 = vmatmul.msk.f32.vlgmr.msrb.gmra.mxu3 %vm408_vm10, %v486_v53 }
 0x458   :  { %1686 = vmatpush.xpose.msk.msra.mxu1 %vm92_vm0, %v2298_v44 }
 0x45a   :  { %v483_v54 = vpop.f32.mrf.mxu2 }
 0x45b   :  { %v487_v55 = vmul.f32 %v1759_v41, %v483_v54  ;;  %v608_v54 = vperm.slane %v2040_v46, 1 }
 0x45d   :  { %1643 = vmatmul.msk.f32.gmra.mxu3 %vm408_vm10, %v487_v55 }
 0x4d8   :  { %v511_v57 = vpop.f32.mrf.mxu3 }
 0x4d9   :  { %1649 = vmatmul.msk.f32.vlgmr.msra.gmra.mxu0 %vm92_vm0, %v511_v57 }
 0x4e0   :  { %v514_v58 = vpop.f32.mrf.mxu3 }
 0x4e1   :  { %1650 = vmatmul.msk.f32.vlgmr.msra.gmra.mxu3 %vm92_vm0, %v514_v58 }
 0x556   :  { %v550_v62 = vpop.f32.mrf.mxu0 }
 0x557   :  { %v551_v63 = vadd.f32 %v1743_v60, %v550_v62 }
 0x559   :  { %v557_v1 = vmul.f32 %v556_v61, %v551_v63 }
 0x55b   :  { %v2204_v3 = vadd.f32 %v557_v1, %v1987_v2  ;;  %v1670_v2 = vld [vmem:[%s2820_s1 + $0x20] sm:$0xff] }
 0x55d   :  { %v561_v4 = vsel %vm92_vm0, %v2204_v3, 0.0 }
 0x55e   :  { %562 = vadd.xlane.f32.xlu2 %v561_v4 }
 0x564   :  { %v553_v5 = vpop.f32.mrf.mxu3 }
 0x565   :  { %v554_v6 = vadd.f32 %v1743_v60, %v553_v5  ;;  %v1666_v5 = vld [vmem:[%s2819_s0 + $0xa0] sm:$0xff] }
 0x567   :  { %v558_v7 = vmul.f32 %v556_v61, %v554_v6  ;;  %v1667_v6 = vld [vmem:[%s2819_s0 + $0xa8] sm:$0xff] }
 0x569   :  { %v2209_v8 = vadd.f32 %v558_v7, %v1980_v0  ;;  %v1668_v7 = vld [vmem:[%s2819_s0 + $0xb0] sm:$0xff] }
 0x56b   :  { %v564_v9 = vsel %vm92_vm0, %v2209_v8, 0.0 }
 0x56c   :  { %565 = vadd.xlane.f32.xlu1 %v564_v9  ;;  %v1669_v9 = vld [vmem:[%s2819_s0 + $0xb8] sm:$0xff] }
 0x585   :  { %886 = vperm.xlu1 %1740, %v1673_v11   ;;  %v692_v11 = vld [vmem:[%s2826_s10] sm:$0x77] }
 0x586   :  { %694 = vst [vmem:[#allocation1] ss:$2 sm:$0xff] %v692_v11 }
 0x58d   :  { %871 = vperm.xlu1 %1740, %v1670_v2   ;;  %v1744_v2 = vld [vmem:[%s2827_s6] ss:$0 sm:$0xff] }
 0x5d1   :  { %v563_v12 = vpop.xlane.xlu2 %562 }
 0x5d2   :  { %v567_v13 = vmul.f32 %v563_v12, %v1991_v10  ;;  %v695_v12 = vld.sshfl [vmem:[#allocation1] sm:$0xff pattern:$0x75316420] }
 0x5d3   :  { %1655 = vmatpush.msk.msra.mxu2 %vm704_vm4, %v695_v12 }
 0x5d4   :  { %v569_v0 = vsub.f32 %v2204_v3, %v567_v13  ;;  %v696_v13 = vld.sshfl [vmem:[#allocation1 + $0x8] sm:$0xff pattern:$0x75316420] }
 0x5d5   :  { %1658 = vmatpush.msk.msrb.mxu3 %vm704_vm4, %v696_v13 }
 0x5d6   :  { %v571_v14 = vmul.f32 %v569_v0, %v569_v0 }
 0x5d8   :  { %v573_v15 = vsel %vm92_vm0, %v571_v14, 0.0 }
 0x5d9   :  { %574 = vadd.xlane.f32.xlu2 %v573_v15 }
 0x5df   :  { %v566_v16 = vpop.xlane.xlu1 %565 }
 0x5e0   :  { %v568_v17 = vmul.f32 %v566_v16, %v1991_v10 }
 0x5e2   :  { %v2224_v18 = vsub.f32 %v2209_v8, %v568_v17 }
 0x5e4   :  { %v572_v19 = vmul.f32 %v2224_v18, %v2224_v18 }
 0x5e6   :  { %v576_v20 = vsel %vm92_vm0, %v572_v19, 0.0 }
 0x5e7   :  { %577 = vadd.xlane.f32.xlu0 %v576_v20 }
 0x5f1   :  { %881 = vperm.xlu2 %1738, %v1672_v21  }
 0x5f7   :  { %v887_v17 = vpop.permute.xlu1 %886 }
 0x5fb   :  { %876 = vperm.xlu0 %1739, %v1671_v22  }
 0x5ff   :  { %v872_v24 = vpop.permute.xlu1 %871 }
 0x64c   :  { %v575_v32 = vpop.xlane.xlu2 %574 }
 0x64d   :  { %v579_v34 = vmul.f32 %v575_v32, %v1991_v10 }
 0x64f   :  { %v581_v35 = vadd.f32 1e-05, %v579_v34 }
 0x651   :  { %1764 = vrsqrt.f32 %v581_v35  ;;  %vm589_vm14 = vweird.f32 %v581_v35 }
 0x657   :  { %v1765_v38 = vpop.eup %1764 }
 0x658   :  { %v584_v40 = vmul.f32 %v1765_v38, %v581_v35  ;;  %vm590_vm13 = vweird.f32 %v1765_v38 }
 0x659   :  { %vm591_vm15 = vmor %vm589_vm14, %vm590_vm13 }
 0x65a   :  { %v585_v41 = vmul.f32 %v1765_v38, %v584_v40  ;;  %v578_v43 = vpop.xlane.xlu0 %577 }
 0x65b   :  { %v580_v45 = vmul.f32 %v578_v43, %v1991_v10 }
 0x65c   :  { %v586_v47 = vmul.f32 0.5, %v585_v41 }
 0x65d   :  { %v582_v48 = vadd.f32 1e-05, %v580_v45 }
 0x65e   :  { %v587_v49 = vsub.f32 1.5, %v586_v47 }
 0x65f   :  { %1766 = vrsqrt.f32 %v582_v48  ;;  %vm599_vm2 = vweird.f32 %v582_v48 }
 0x660   :  { %v588_v50 = vmul.f32 %v1765_v38, %v587_v49 }
 0x662   :  { %v592_v52 = vsel %vm591_vm15, %v1765_v38, %v588_v50 }
 0x663   :  { %v603_v53 = vmul.f32 %v592_v52, %v569_v0  ;;  %v882_v52 = vpop.permute.xlu2 %881 }
 0x665   :  { %v1767_v55 = vpop.eup %1766  ;;  %v606_v56 = vmul.f32 %v605_v51, %v603_v53 }
 0x666   :  { %v594_v57 = vmul.f32 %v1767_v55, %v582_v48  ;;  %vm600_vm1 = vweird.f32 %v1767_v55 }
 0x667   :  { %v609_v58 = vadd.f32 %v608_v54, %v606_v56  ;;  %vm601_vm3 = vmor %vm599_vm2, %vm600_vm1 }
 0x668   :  { %v595_v60 = vmul.f32 %v1767_v55, %v594_v57 }
 0x669   :  { %1651 = vmatmul.msk.f32.vlgmr.msrb.gmra.mxu1 %vm92_vm0, %v609_v58  ;;  %1679 = vmatmul.msk.f32.vlgmr.msrb.gmra.mxu0 %vm92_vm0, %v609_v58 }
 0x66a   :  { %v596_v61 = vmul.f32 0.5, %v595_v60 }
 0x66c   :  { %v597_v62 = vsub.f32 1.5, %v596_v61 }
 0x66d   :  { %v877_v41 = vpop.permute.xlu0 %876 }
 0x66e   :  { %v598_v63 = vmul.f32 %v1767_v55, %v597_v62 }
 0x670   :  { %v602_v42 = vsel %vm601_vm3, %v1767_v55, %v598_v63  ;;  %vm1030_vm3 = vcmask 785408  }
 0x671   :  { %v604_v1 = vmul.f32 %v602_v42, %v2224_v18 }
 0x673   :  { %v607_v4 = vmul.f32 %v605_v51, %v604_v1 }
 0x675   :  { %v610_v46 = vadd.f32 %v608_v54, %v607_v4 }
 0x677   :  { %1652 = vmatmul.msk.f32.gmra.mxu1 %vm92_vm0, %v610_v46  ;;  %1680 = vmatmul.msk.f32.gmra.mxu0 %vm92_vm0, %v610_v46 }
 0x67f   :  { %1687 = vmatmul.msk.f32.vlgmr.msra.gmra.mxu1 %vm92_vm0, %v1666_v5 }
 0x687   :  { %1688 = vmatmul.msk.f32.gmra.mxu1 %vm92_vm0, %v1667_v6  ;;  %v790_v6 = vld [vmem:[%s2789_s20 + $0x38] sm:$0xff] }
 0x68f   :  { %1689 = vmatmul.msk.f32.gmra.mxu1 %vm92_vm0, %v1668_v7 }
 0x697   :  { %1690 = vmatmul.msk.f32.gmra.mxu1 %vm92_vm0, %v1669_v9 }
 0x6e6   :  { %v648_v0 = vpop.f32.mrf.mxu1 }
 0x6e7   :  { %v649_v14 = vadd.f32 %v1744_v2, %v648_v0 }
 0x6e9   :  { %v1653_v15 = vmul.f32 -1.442695, %v649_v14  ;;  %v789_v14 = vld [vmem:[%s2789_s20 + $0x30] sm:$0xff] }
 0x6eb   :  { %1768 = vpow2.f32 %v1653_v15 }
 0x6f1   :  { %v1769_v16 = vpop.eup %1768 }
 0x6f2   :  { %v660_v18 = vadd.f32 1.0, %v1769_v16 }
 0x6f4   :  { %1770 = vrcp.f32 %v660_v18  ;;  %v651_v19 = vpop.f32.mrf.mxu1  ;;  %v673_v28 = vand.u32 2147483648, %v660_v18  ;;  %v671_v32 = vand.u32 2147483647, %v660_v18  ;;  %vm667_vm6 = vweird.f32 %v660_v18 }
 0x6f5   :  { %v652_v20 = vadd.f32 %v1744_v2, %v651_v19 }
 0x6f6   :  { %v674_v38 = vor.u32 1.1754944e-38, %v673_v28  ;;  %vm672_vm13 = vcmp.eq.f32.partialorder %v671_v32, 8.507059e+37  ;;  %v1745_v28 = vld [vmem:[%s2821_s3 + $0x3] ss:$0 sm:$0xff] }
 0x6f7   :  { %v1654_v21 = vmul.f32 -1.442695, %v652_v20  ;;  %v787_v20 = vld [vmem:[%s2789_s20 + $0x20] sm:$0xff] }
 0x6f9   :  { %1772 = vpow2.f32 %v1654_v21 }
 0x6fa   :  { %v1771_v22 = vpop.eup %1770 }
 0x6fb   :  { %v663_v23 = vmul.f32 %v1771_v22, %v660_v18  ;;  %vm668_vm5 = vweird.f32 %v1771_v22 }
 0x6fc   :  { %v936_v25 = vpop.f32.mrf.mxu1  ;;  %vm669_vm7 = vmor %vm667_vm6, %vm668_vm5 }
 0x6fd   :  { %v664_v26 = vsub.f32 1.0, %v663_v23  ;;  %v2332_v27 = vadd.f32 %v936_v25, %v872_v24  ;;  %v785_v23 = vld [vmem:[%s2789_s20 + $0x10] sm:$0xff] }
 0x6ff   :  { %v1773_v29 = vpop.eup %1772  ;;  %990 = vrot.lane.b32.xlu0 %v2332_v27, %s1831_s30  ;;  %v665_v30 = vmul.f32 %v1771_v22, %v664_v26 }
 0x700   :  { %v661_v34 = vadd.f32 1.0, %v1773_v29 }
 0x701   :  { %v666_v35 = vadd.f32 %v1771_v22, %v665_v30  ;;  %v783_v30 = vld [vmem:[%s2789_s20] sm:$0xff] }
 0x702   :  { %1774 = vrcp.f32 %v661_v34  ;;  %v688_v54 = vand.u32 2147483648, %v661_v34  ;;  %v686_v57 = vand.u32 2147483647, %v661_v34  ;;  %vm682_vm15 = vweird.f32 %v661_v34 }
 0x703   :  { %v670_v40 = vsel %vm669_vm7, %v1771_v22, %v666_v35 }
 0x704   :  { %v939_v43 = vpop.f32.mrf.mxu1  ;;  %v675_v45 = vsel %vm672_vm13, %v674_v38, %v670_v40  ;;  %v689_v60 = vor.u32 1.1754944e-38, %v688_v54  ;;  %vm687_vm2 = vcmp.eq.f32.partialorder %v686_v57, 8.507059e+37  ;;  %v788_v38 = vld [vmem:[%s2789_s20 + $0x28] sm:$0xff]  ;;  %v829_v57 = vld [vmem:[%s2794_s25 + $0x70] sm:$0xff] }
 0x705   :  { %v940_v47 = vadd.f32 %v939_v43, %v877_v41  ;;  %1656 = vmatmul.msk.f32.vlgmr.msra.gmra.mxu2 %vm697_vm12, %v675_v45  ;;  %1659 = vmatmul.msk.f32.vlgmr.msrb.gmra.mxu3 %vm697_vm12, %v675_v45  ;;  %v1316_v48 = vsel %vm697_vm12, %v675_v45, 0.0  ;;  %v786_v41 = vld [vmem:[%s2789_s20 + $0x18] sm:$0xff] }
 0x707   :  { %1004 = vrot.lane.b32.xlu1 %v940_v47, %s1832_s11  ;;  %992 = vrot.lane.b32.xlu2 %v940_v47, %s1831_s30 }
 0x708   :  { %v1775_v49 = vpop.eup %1774 }
 0x709   :  { %v678_v50 = vmul.f32 %v1775_v49, %v661_v34  ;;  %vm683_vm14 = vweird.f32 %v1775_v49  ;;  %v863_v34 = vpop.f32.mrf.mxu0 }
 0x70a   :  { %vm684_vm1 = vmor %vm682_vm15, %vm683_vm14 }
 0x70b   :  { %v679_v51 = vsub.f32 1.0, %v678_v50  ;;  %v784_v50 = vld [vmem:[%s2789_s20 + $0x8] sm:$0xff] }
 0x70c   :  { %v942_v53 = vpop.f32.mrf.mxu1 }
 0x70d   :  { %v943_v55 = vadd.f32 %v942_v53, %v882_v52  ;;  %v680_v56 = vmul.f32 %v1775_v49, %v679_v51 }
 0x70f   :  { %994 = vrot.lane.b32.xlu1 %v943_v55, %s1831_s30  ;;  %1006 = vrot.lane.b32.xlu0 %v943_v55, %s1832_s11  ;;  %v681_v58 = vadd.f32 %v1775_v49, %v680_v56  ;;  %v830_v56 = vld [vmem:[%s2794_s25 + $0x78] sm:$0xff] }
 0x711   :  { %v685_v61 = vsel %vm684_vm1, %v1775_v49, %v681_v58  ;;  %v866_v54 = vpop.f32.mrf.mxu0  ;;  %v828_v58 = vld [vmem:[%s2794_s25 + $0x68] sm:$0xff] }
 0x712   :  { %v690_v62 = vsel %vm687_vm2, %v689_v60, %v685_v61  ;;  %v838_v61 = vld [vmem:[%s2794_s25 + $0xb8] sm:$0xff] }
 0x713   :  { %1657 = vmatmul.msk.f32.gmra.mxu2 %vm697_vm12, %v690_v62  ;;  %1660 = vmatmul.msk.f32.gmra.mxu3 %vm697_vm12, %v690_v62  ;;  %v2344_v63 = vsel %vm697_vm12, %v690_v62, 0.0  ;;  %v837_v62 = vld [vmem:[%s2794_s25 + $0xb0] sm:$0xff] }
 0x714   :  { %v945_v42 = vpop.f32.mrf.mxu1 }
 0x715   :  { %v946_v1 = vadd.f32 %v945_v42, %v887_v17  ;;  %v827_v42 = vld [vmem:[%s2794_s25 + $0x60] sm:$0xff] }
 0x717   :  { %1008 = vrot.lane.b32.xlu2 %v946_v1, %s1832_s11  ;;  %1002 = vrot.lane.b32.xlu1 %v2332_v27, %s1832_s11 }
 0x718   :  { %996 = vrot.lane.b32.xlu0 %v946_v1, %s1831_s30 }
 0x71f   :  { %1020 = vrot.lane.b32.xlu2 %v946_v1, %s1829_s4  ;;  %1014 = vrot.lane.b32.xlu1 %v2332_v27, %s1829_s4 }
 0x720   :  { %1018 = vrot.lane.b32.xlu0 %v943_v55, %s1829_s4 }
 0x727   :  { %1016 = vrot.lane.b32.xlu2 %v940_v47, %s1829_s4 }
 0x749   :  { %1317 = vadd.xlane.f32.xlu1 %v1316_v48  ;;  %v864_v48 = vadd.f32 %v1745_v28, %v863_v34  ;;  %v833_v34 = vld [vmem:[%s2794_s25 + $0x90] sm:$0xff] }
 0x761   :  { %v993_v4 = vpop.permute.xlu2 %992 }
 0x762   :  { %v1027_v21 = vsel %vm362_vm9, %v940_v47, %v993_v4  ;;  %v825_v4 = vld [vmem:[%s2794_s25 + $0x50] sm:$0xff] }
 0x771   :  { %v1009_v46 = vpop.permute.xlu2 %1008  ;;  %v991_v5 = vpop.permute.xlu0 %990 }
 0x772   :  { %v1026_v25 = vsel %vm362_vm9, %v2332_v27, %v991_v5 }
 0x779   :  { %v1021_v7 = vpop.permute.xlu2 %1020  ;;  %v1005_v9 = vpop.permute.xlu1 %1004 }
 0x77a   :  { %v1038_v11 = vsel %vm353_vm8, %v1009_v46, %v1021_v7  ;;  %v1032_v24 = vsel %vm1030_vm3, %v1027_v21, %v1005_v9  ;;  %v822_v7 = vld [vmem:[%s2794_s25 + $0x38] sm:$0xff] }
 0x77b   :  { %v1046_v2 = vmul.f32 %v1038_v11, %v790_v6  ;;  %v1041_v35 = vmul.f32 %v1032_v24, %v785_v23  ;;  %v823_v6 = vld [vmem:[%s2794_s25 + $0x40] sm:$0xff]  ;;  %v821_v11 = vld [vmem:[%s2794_s25 + $0x30] sm:$0xff] }
 0x77d   :  { %1112 = vmatpush.msra.mxu0 %v1046_v2  ;;  %v779_v2 = vld [vmem:[%s2787_s18] sm:$0xff] }
 0x781   :  { %v1007_v12 = vpop.permute.xlu0 %1006  ;;  %v995_v13 = vpop.permute.xlu1 %994 }
 0x782   :  { %v1028_v0 = vsel %vm362_vm9, %v943_v55, %v995_v13  ;;  %v1017_v29 = vpop.permute.xlu2 %1016  ;;  %v867_v55 = vadd.f32 %v1745_v28, %v866_v54  ;;  %v819_v28 = vld [vmem:[%s2794_s25 + $0x20] sm:$0xff] }
 0x783   :  { %v1033_v18 = vsel %vm1030_vm3, %v1028_v0, %v1007_v12  ;;  %v1036_v43 = vsel %vm353_vm8, %v1005_v9, %v1017_v29  ;;  %v780_v9 = vld [vmem:[%s2787_s18 + $0x8] sm:$0xff]  ;;  %v835_v29 = vld [vmem:[%s2794_s25 + $0xa0] sm:$0xff] }
 0x784   :  { %v1043_v26 = vmul.f32 %v1033_v18, %v787_v20  ;;  %v1042_v52 = vmul.f32 %v1036_v43, %v786_v41  ;;  %v781_v18 = vld [vmem:[%s2787_s18 + $0x10] sm:$0xff]  ;;  %v1677_v41 = vld [vmem:[%s2819_s0 + $0xd8] sm:$0xff] }
 0x785   :  { %v1676_v43 = vld [vmem:[%s2819_s0 + $0xd0] sm:$0xff]  ;;  %963 = vmatpush.msrb.mxu2 %v1677_v41  ;;  %v812_v41 = vld [vmem:[%s2791_s22 + $0xa8] sm:$0xff] }
 0x787   :  { %964 = vmatpush.msrb.mxu2 %v1676_v43 }
 0x788   :  { %v2402_v60 = vpop.f32.mrf.mxu3 }
 0x789   :  { %v1003_v16 = vpop.permute.xlu1 %1002 }
 0x78a   :  { %v997_v15 = vpop.permute.xlu0 %996  ;;  %v1031_v32 = vsel %vm1030_vm3, %v1026_v25, %v1003_v16  ;;  %v820_v25 = vld [vmem:[%s2794_s25 + $0x28] sm:$0xff] }
 0x78b   :  { %v1029_v17 = vsel %vm362_vm9, %v946_v1, %v997_v15  ;;  %v1039_v45 = vmul.f32 %v1031_v32, %v783_v30  ;;  %v826_v1 = vld [vmem:[%s2794_s25 + $0x58] sm:$0xff]  ;;  %v817_v32 = vld [vmem:[%s2794_s25 + $0x10] sm:$0xff] }
 0x78c   :  { %v1034_v19 = vsel %vm1030_vm3, %v1029_v17, %v1009_v46  ;;  %v824_v46 = vld [vmem:[%s2794_s25 + $0x48] sm:$0xff]  ;;  %v782_v17 = vld [vmem:[%s2787_s18 + $0x18] sm:$0xff] }
 0x78d   :  { %v1045_v22 = vmul.f32 %v1034_v19, %v789_v14  ;;  %v834_v30 = vld [vmem:[%s2794_s25 + $0x98] sm:$0xff] }
 0x78f   :  { %1089 = vmatpush.msra.mxu3 %v1045_v22 }
 0x791   :  { %1090 = vmatpush.msra.mxu3 %v1043_v26  ;;  %v1015_v40 = vpop.permute.xlu1 %1014  ;;  %v836_v26 = vld [vmem:[%s2794_s25 + $0xa8] sm:$0xff] }
 0x792   :  { %v1019_v27 = vpop.permute.xlu0 %1018  ;;  %v1035_v51 = vsel %vm353_vm8, %v1003_v16, %v1015_v40  ;;  %v831_v40 = vld [vmem:[%s2794_s25 + $0x80] sm:$0xff] }
 0x793   :  { %v1037_v47 = vsel %vm353_vm8, %v1007_v12, %v1019_v27  ;;  %1091 = vmatpush.msra.mxu3 %v1041_v35  ;;  %v1040_v53 = vmul.f32 %v1035_v51, %v784_v50  ;;  %v816_v35 = vld [vmem:[%s2794_s25 + $0x8] sm:$0xff]  ;;  %v815_v27 = vld [vmem:[%s2794_s25] sm:$0xff]  ;;  %vm1197_vm8 = vcmask 97280  }
 0x794   :  { %v1044_v49 = vmul.f32 %v1037_v47, %v788_v38  ;;  %v832_v38 = vld [vmem:[%s2794_s25 + $0x88] sm:$0xff]  ;;  %v1674_v47 = vld [vmem:[%s2819_s0 + $0xc0] sm:$0xff] }
 0x795   :  { %1092 = vmatpush.msra.mxu3 %v1039_v45  ;;  %v1675_v45 = vld [vmem:[%s2819_s0 + $0xc8] sm:$0xff] }
 0x796   :  { %1697 = vmatmul.msk.f32.vlgmr.msra.gmra.mxu3 %vm92_vm0, %v864_v48  ;;  %1113 = vmatpush.msra.mxu0 %v1044_v49  ;;  %v2422_v5 = vpop.f32.mrf.mxu3 }
 0x797   :  { %1149 = vmatpush.msrb.mxu3 %v830_v56  ;;  %965 = vmatpush.msrb.mxu2 %v1675_v45 }
 0x798   :  { %1114 = vmatpush.msra.mxu0 %v1042_v52 }
 0x799   :  { %1150 = vmatpush.msrb.mxu3 %v829_v57  ;;  %966 = vmatpush.msrb.mxu2 %v1674_v47 }
 0x79a   :  { %1115 = vmatpush.msra.mxu0 %v1040_v53  ;;  %1691 = vmatmul.msk.f32.vlgmr.msrb.gmra.mxu2 %vm92_vm0, %v2298_v44 }
 0x79b   :  { %1699 = vmatmul.msk.f32.vlgmr.msra.gmra.mxu0 %vm92_vm0, %v864_v48  ;;  %1151 = vmatpush.msrb.mxu3 %v828_v58  ;;  %v841_v48 = vld [vmem:[%s2795_s26 + $0x10] sm:$0xf] }
 0x79c   :  { %1180 = vmatpush.msrb.mxu0 %v838_v61  ;;  %1703 = vmatpush.msk.msrb.mxu1 %vm459_vm11, %v841_v48 }
 0x79d   :  { %1152 = vmatpush.msrb.mxu3 %v827_v42 }
 0x79e   :  { %1698 = vmatmul.msk.f32.gmra.mxu3 %vm92_vm0, %v867_v55  ;;  %1181 = vmatpush.msrb.mxu0 %v837_v62  ;;  %v2526_v62 = vpop.f32.mrf.mxu2 }
 0x79f   :  { %1153 = vmatpush.msrb.mxu3 %v826_v1  ;;  %v842_v1 = vld [vmem:[%s2795_s26 + $0x18] sm:$0xf] }
 0x7a0   :  { %1182 = vmatpush.msrb.mxu0 %v836_v26 }
 0x7a1   :  { %1154 = vmatpush.msrb.mxu3 %v825_v4 }
 0x7a2   :  { %1183 = vmatpush.msrb.mxu0 %v835_v29  ;;  %1692 = vmatmul.msk.f32.gmra.mxu2 %vm92_vm0, %v2291_v39 }
 0x7a3   :  { %1700 = vmatmul.msk.f32.gmra.mxu0 %vm92_vm0, %v867_v55  ;;  %1155 = vmatpush.msrb.mxu3 %v824_v46 }
 0x7a4   :  { %1184 = vmatpush.msrb.mxu0 %v834_v30  ;;  %v802_v30 = vld [vmem:[%s2791_s22 + $0x58] sm:$0xff] }
 0x7a5   :  { %1156 = vmatpush.msrb.mxu3 %v823_v6 }
 0x7a6   :  { %1185 = vmatpush.msrb.mxu0 %v833_v34  ;;  %v2528_v42 = vpop.f32.mrf.mxu2  ;;  %v801_v34 = vld [vmem:[%s2791_s22 + $0x50] sm:$0xff] }
 0x7a7   :  { %1157 = vmatpush.msrb.mxu3 %v822_v7  ;;  %v1747_v7 = vld [vmem:[%s2821_s3 + $0x4] ss:$0 sm:$0xff] }
 0x7a8   :  { %1186 = vmatpush.msrb.mxu0 %v832_v38  ;;  %v813_v38 = vld [vmem:[%s2791_s22 + $0xb0] sm:$0xff] }
 0x7a9   :  { %1158 = vmatpush.msrb.mxu3 %v821_v11 }
 0x7aa   :  { %1187 = vmatpush.msrb.mxu0 %v831_v40  ;;  %1693 = vmatmul.msk.f32.gmra.mxu2 %vm92_vm0, %v2284_v37  ;;  %v800_v40 = vld [vmem:[%s2791_s22 + $0x48] sm:$0xff] }
 0x7ab   :  { %1159 = vmatpush.msrb.mxu3 %v820_v25 }
 0x7ac   :  { %1706 = vmatpush.msk.msra.mxu0 %vm459_vm11, %v842_v1 }
 0x7ad   :  { %1160 = vmatpush.msrb.mxu3 %v819_v28 }
 0x7b2   :  { %1694 = vmatmul.msk.f32.gmra.mxu2 %vm92_vm0, %v2277_v36  ;;  %v839_v36 = vld [vmem:[%s2795_s26] sm:$0xff] }
 0x7b3   :  { %1225 = vmatpush.msrb.mxu1 %v839_v36 }
 0x7ba   :  { %1695 = vmatmul.msk.f32.gmra.mxu2 %vm92_vm0, %v2269_v33  ;;  %v840_v33 = vld [vmem:[%s2795_s26 + $0x8] sm:$0xff] }
 0x7bb   :  { %1248 = vmatpush.msra.mxu0 %v840_v33  ;;  %v796_v33 = vld [vmem:[%s2791_s22 + $0x28] sm:$0xff] }
 0x7c2   :  { %1696 = vmatmul.msk.f32.gmra.mxu2 %vm92_vm0, %v2262_v31 }
 0x818   :  { %v1117_v12 = vpop.f32.mrf.mxu0 }
 0x819   :  { %v1118_v13 = vadd.f32 %v1117_v12, %v780_v9  ;;  %v1094_v0 = vpop.f32.mrf.mxu3 }
 0x81a   :  { %v1095_v14 = vadd.f32 %v1094_v0, %v779_v2  ;;  %v805_v0 = vld [vmem:[%s2791_s22 + $0x70] sm:$0xff] }
 0x81b   :  { %v1123_v15 = vsel %vm408_vm10, %v1118_v13, -inf }
 0x81c   :  { %v1124_v16 = vmax.f32 %v1095_v14, %v1123_v15 }
 0x81d   :  { %v968_v31 = vpop.f32.mrf.mxu2 }
 0x81e   :  { %1125 = vmax.xlane.f32.xlu0 %v1124_v16  ;;  %v804_v16 = vld [vmem:[%s2791_s22 + $0x68] sm:$0xff] }
 0x820   :  { %v1120_v19 = vpop.f32.mrf.mxu0 }
 0x821   :  { %v1121_v20 = vadd.f32 %v1120_v19, %v782_v17  ;;  %v1097_v21 = vpop.f32.mrf.mxu3  ;;  %v2558_v17 = vadd.f32 %v1747_v7, %v968_v31  ;;  %v808_v31 = vld [vmem:[%s2791_s22 + $0x88] sm:$0xff] }
 0x822   :  { %v1098_v22 = vadd.f32 %v1097_v21, %v781_v18 }
 0x823   :  { %v1127_v23 = vsel %vm408_vm10, %v1121_v20, -inf }
 0x824   :  { %v1128_v24 = vmax.f32 %v1098_v22, %v1127_v23 }
 0x825   :  { %v971_v4 = vpop.f32.mrf.mxu2 }
 0x826   :  { %1129 = vmax.xlane.f32.xlu2 %v1128_v24  ;;  %1320 = vadd.xlane.f32.xlu0 %v2344_v63  ;;  %v818_v63 = vld [vmem:[%s2794_s25 + $0x18] sm:$0xff] }
 0x827   :  { %1161 = vmatpush.msrb.mxu3 %v818_v63 }
 0x829   :  { %1162 = vmatpush.msrb.mxu3 %v817_v32 }
 0x82b   :  { %1163 = vmatpush.msrb.mxu3 %v816_v35  ;;  %v814_v35 = vld [vmem:[%s2791_s22 + $0xb8] sm:$0xff] }
 0x82d   :  { %1164 = vmatpush.msrb.mxu3 %v815_v27  ;;  %v974_v46 = vpop.f32.mrf.mxu2 }
 0x82e   :  { %v2543_v2 = vadd.f32 %v1747_v7, %v974_v46 }
 0x830   :  { %v1061_v19 = vmul.f32 %v2543_v2, %v805_v0 }
 0x835   :  { %v977_v12 = vpop.f32.mrf.mxu2 }
 0x836   :  { %v2553_v15 = vadd.f32 %v1747_v7, %v977_v12  ;;  %v794_v12 = vld [vmem:[%s2791_s22 + $0x18] sm:$0xff] }
 0x83d   :  { %v980_v28 = vpop.f32.mrf.mxu2 }
 0x83e   :  { %v981_v63 = vadd.f32 %v1747_v7, %v980_v28 }
 0x840   :  { %v1057_v45 = vmul.f32 %v981_v63, %v801_v34  ;;  %v1069_v48 = vmul.f32 %v981_v63, %v813_v38  ;;  %v1746_v38 = vld [vmem:[%s2821_s3 + $0x5] ss:$0 sm:$0xff] }
 0x845   :  { %v983_v32 = vpop.f32.mrf.mxu2 }
 0x846   :  { %v984_v27 = vadd.f32 %v1747_v7, %v983_v32 }
 0x848   :  { %v1058_v43 = vmul.f32 %v984_v27, %v802_v30  ;;  %v1070_v47 = vmul.f32 %v984_v27, %v814_v35 }
 0x84a   :  { %1301 = vmatpush.msra.mxu3 %v1070_v47 }
 0x84c   :  { %1302 = vmatpush.msra.mxu3 %v1069_v48 }
 0x891   :  { %v1126_v49 = vpop.xlane.xlu0 %1125 }
 0x892   :  { %v1131_v50 = vsub.f32 %v1095_v14, %v1126_v49  ;;  %v1132_v51 = vsub.f32 %v1118_v13, %v1126_v49  ;;  %v806_v13 = vld [vmem:[%s2791_s22 + $0x78] sm:$0xff]  ;;  %v2551_v14 = vadd.f32 %v1747_v7, %v971_v4  ;;  %v799_v49 = vld [vmem:[%s2791_s22 + $0x40] sm:$0xff] }
 0x893   :  { %v1062_v18 = vmul.f32 %v2553_v15, %v806_v13  ;;  %v807_v7 = vld [vmem:[%s2791_s22 + $0x80] sm:$0xff] }
 0x894   :  { %v1135_v52 = vmul.f32 1.442695, %v1131_v50  ;;  %v1137_v53 = vmul.f32 1.442695, %v1132_v51  ;;  %v1060_v21 = vmul.f32 %v2551_v14, %v804_v16  ;;  %v811_v50 = vld [vmem:[%s2791_s22 + $0xa0] sm:$0xff]  ;;  %v1056_v51 = vmul.f32 %v2553_v15, %v800_v40  ;;  %v793_v16 = vld [vmem:[%s2791_s22 + $0x10] sm:$0xff] }
 0x895   :  { %1270 = vmatpush.msra.mxu2 %v1062_v18  ;;  %v1063_v0 = vmul.f32 %v981_v63, %v807_v7  ;;  %v1050_v18 = vmul.f32 %v2553_v15, %v794_v12  ;;  %v1419_v7 = vld [vmem:[%s2828_s2 + $0x8] sm:$0xff] }
 0x896   :  { %1776 = vpow2.f32 %v1135_v52  ;;  %v1068_v52 = vmul.f32 %v2553_v15, %v812_v41  ;;  %v1714_v15 = vld [vmem:[%s2819_s0 + $0xf8] sm:$0xff]  ;;  %v1363_v41 = vperm.slane %v2197_v59, 1 }
 0x897   :  { %1778 = vpow2.f32 %v1137_v53  ;;  %1271 = vmatpush.msra.mxu2 %v1061_v19  ;;  %v798_v53 = vld [vmem:[%s2791_s22 + $0x38] sm:$0xff]  ;;  %v792_v19 = vld [vmem:[%s2791_s22 + $0x8] sm:$0xff]  ;;  %1352 = vmatpush.msra.mxu1 %v1714_v15 }
 0x898   :  { %v1054_v36 = vmul.f32 %v2551_v14, %v798_v53  ;;  %1303 = vmatpush.msra.mxu3 %v1068_v52 }
 0x899   :  { %v1130_v44 = vpop.xlane.xlu2 %1129  ;;  %1272 = vmatpush.msra.mxu2 %v1060_v21  ;;  %v791_v21 = vld [vmem:[%s2791_s22] sm:$0xff]  ;;  %v1321_v48 = vpop.xlane.xlu0 %1320 }
 0x89a   :  { %v1133_v54 = vsub.f32 %v1098_v22, %v1130_v44  ;;  %v1134_v55 = vsub.f32 %v1121_v20, %v1130_v44  ;;  %v803_v20 = vld [vmem:[%s2791_s22 + $0x60] sm:$0xff]  ;;  %v810_v44 = vld [vmem:[%s2791_s22 + $0x98] sm:$0xff] }
 0x89b   :  { %v1059_v26 = vmul.f32 %v2558_v17, %v803_v20  ;;  %v1066_v1 = vmul.f32 %v2551_v14, %v810_v44  ;;  %v1049_v20 = vmul.f32 %v2543_v2, %v793_v16 }
 0x89c   :  { %v2506_v39 = vpop.eup %1776  ;;  %v1139_v56 = vmul.f32 1.442695, %v1133_v54  ;;  %v1141_v57 = vmul.f32 1.442695, %v1134_v55  ;;  %v1055_v54 = vmul.f32 %v2543_v2, %v799_v49  ;;  %v1067_v55 = vmul.f32 %v2543_v2, %v811_v50  ;;  %v1713_v2 = vld [vmem:[%s2819_s0 + $0xf0] sm:$0xff] }
 0x89d   :  { %v2508_v58 = vpop.eup %1778  ;;  %1165 = vmatmul.f32.vlgmr.msrb.gmra.mxu3 %v2506_v39  ;;  %1273 = vmatpush.msra.mxu2 %v1059_v26  ;;  %v1333_v50 = vmul.f32 %v1746_v38, %v1321_v48 }
 0x89e   :  { %1780 = vpow2.f32 %v1139_v56  ;;  %1701 = vmatmul.msk.f32.vlgmr.msrb.gmra.mxu0 %vm408_vm10, %v2508_v58  ;;  %v797_v56 = vld [vmem:[%s2791_s22 + $0x30] sm:$0xff]  ;;  %1304 = vmatpush.msra.mxu3 %v1067_v55 }
 0x89f   :  { %1782 = vpow2.f32 %v1141_v57  ;;  %1274 = vmatpush.msra.mxu2 %v1058_v43  ;;  %v809_v57 = vld [vmem:[%s2791_s22 + $0x90] sm:$0xff]  ;;  %v1053_v4 = vmul.f32 %v2558_v17, %v797_v56  ;;  %1353 = vmatpush.msra.mxu1 %v1713_v2 }
 0x8a0   :  { %v1065_v46 = vmul.f32 %v2558_v17, %v809_v57  ;;  %1305 = vmatpush.msra.mxu3 %v1066_v1 }
 0x8a1   :  { %1275 = vmatpush.msra.mxu2 %v1057_v45 }
 0x8a2   :  { %1306 = vmatpush.msra.mxu3 %v1065_v46  ;;  %v1421_v46 = vld [vmem:[%s2828_s2 + $0x18] sm:$0xff] }
 0x8a3   :  { %1276 = vmatpush.msra.mxu2 %v1056_v51  ;;  %1444 = vmatpush.msrb.mxu0 %v1421_v46 }
 0x8a4   :  { %v2515_v37 = vpop.eup %1780 }
 0x8a5   :  { %v2517_v61 = vpop.eup %1782  ;;  %1168 = vmatmul.f32.gmra.mxu3 %v2515_v37  ;;  %1277 = vmatpush.msra.mxu2 %v1055_v54 }
 0x8a6   :  { %1702 = vmatmul.msk.f32.gmra.mxu0 %vm408_vm10, %v2517_v61 }
 0x8a7   :  { %1278 = vmatpush.msra.mxu2 %v1054_v36 }
 0x8a9   :  { %1279 = vmatpush.msra.mxu2 %v1053_v4 }
 0x91b   :  { %v1189_v6 = vpop.f32.mrf.mxu0 }
 0x920   :  { %v1166_v9 = vpop.f32.mrf.mxu3 }
 0x921   :  { %v1190_v11 = vadd.f32 %v1189_v6, %v1166_v9  ;;  %v795_v6 = vld [vmem:[%s2791_s22 + $0x20] sm:$0xff]  ;;  %v1052_v9 = vmul.f32 %v984_v27, %v796_v33 }
 0x922   :  { %v1051_v13 = vmul.f32 %v981_v63, %v795_v6  ;;  %v1420_v6 = vld [vmem:[%s2828_s2 + $0x10] sm:$0xff] }
 0x923   :  { %1784 = vrcp.f32 %v1190_v11  ;;  %v1192_v22 = vpop.f32.mrf.mxu0  ;;  %v1064_v11 = vmul.f32 %v984_v27, %v808_v31  ;;  %1280 = vmatpush.msra.mxu2 %v1052_v9  ;;  %v1318_v27 = vpop.xlane.xlu1 %1317  ;;  %1445 = vmatpush.msrb.mxu0 %v1420_v6  ;;  %v1418_v9 = vld [vmem:[%s2828_s2] sm:$0xff] }
 0x924   :  { %v1332_v40 = vmul.f32 %v1746_v38, %v1318_v27 }
 0x925   :  { %1307 = vmatpush.msra.mxu3 %v1064_v11  ;;  %1281 = vmatpush.msra.mxu2 %v1051_v13 }
 0x926   :  { %1446 = vmatpush.msrb.mxu0 %v1419_v7  ;;  %v1553_v7 = vld [vmem:[%s2781_s12 + $0x18] sm:$0xff] }
 0x927   :  { %1308 = vmatpush.msra.mxu3 %v1063_v0  ;;  %1282 = vmatpush.msra.mxu2 %v1050_v18 }
 0x928   :  { %v1169_v23 = vpop.f32.mrf.mxu3  ;;  %1447 = vmatpush.msrb.mxu0 %v1418_v9 }
 0x929   :  { %v1785_v24 = vpop.eup %1784  ;;  %v1193_v25 = vadd.f32 %v1192_v22, %v1169_v23  ;;  %v1048_v22 = vmul.f32 %v2551_v14, %v792_v19  ;;  %1283 = vmatpush.msra.mxu2 %v1049_v20  ;;  %v1047_v23 = vmul.f32 %v2558_v17, %v791_v21 }
 0x92a   :  { %1704 = vmatmul.msk.f32.vlgmr.msrb.gmra.mxu1 %vm1197_vm8, %v1785_v24  ;;  %1707 = vmatmul.msk.f32.vlgmr.msra.gmra.mxu0 %vm1197_vm8, %v1785_v24 }
 0x92b   :  { %1786 = vrcp.f32 %v1193_v25  ;;  %1284 = vmatpush.msra.mxu2 %v1048_v22 }
 0x92d   :  { %1285 = vmatpush.msra.mxu2 %v1047_v23 }
 0x931   :  { %v1787_v29 = vpop.eup %1786 }
 0x932   :  { %1705 = vmatmul.msk.f32.gmra.mxu1 %vm1197_vm8, %v1787_v29  ;;  %1708 = vmatmul.msk.f32.gmra.mxu0 %vm1197_vm8, %v1787_v29 }
 0x9a7   :  { %v1227_v24 = vpop.f32.mrf.mxu1  ;;  %v1250_v25 = vpop.f32.mrf.mxu0 }
 0x9a8   :  { %v1256_v26 = vmul.f32 %v2506_v39, %v1227_v24  ;;  %v1257_v14 = vmul.f32 %v2508_v58, %v1250_v25  ;;  %v1711_v39 = vld [vmem:[%s2819_s0 + $0xe0] sm:$0xff] }
 0x9a9   :  { %v1798_v25 = vld [vmem:[%s2783_s14] sm:$0x7] }
 0x9aa   :  { %v1260_v17 = vmul.f32 %v1256_v26, %v2526_v62  ;;  %v1261_v28 = vmul.f32 %v1257_v14, %v2402_v60  ;;  %v1712_v60 = vld [vmem:[%s2819_s0 + $0xe8] sm:$0xff]  ;;  %v1412_v26 = vperm.slane %v1798_v25, 2 }
 0x9ab   :  { %1354 = vmatpush.msra.mxu1 %v1712_v60 }
 0x9ac   :  { %1286 = vmatmul.f32.vlgmr.msra.gmra.mxu2 %v1260_v17  ;;  %1709 = vmatmul.msk.f32.vlgmr.msra.gmra.mxu3 %vm408_vm10, %v1261_v28  ;;  %v1799_v17 = vld [vmem:[%s2784_s15] sm:$0x7] }
 0x9ad   :  { %1355 = vmatpush.msra.mxu1 %v1711_v39  ;;  %v1415_v28 = vperm.slane %v1799_v17, 2 }
 0x9af   :  { %v1230_v29 = vpop.f32.mrf.mxu1  ;;  %v1253_v63 = vpop.f32.mrf.mxu0 }
 0x9b0   :  { %v1258_v30 = vmul.f32 %v2515_v37, %v1230_v29  ;;  %v1259_v32 = vmul.f32 %v2517_v61, %v1253_v63 }
 0x9b2   :  { %v1263_v34 = vmul.f32 %v1259_v32, %v2422_v5  ;;  %v1262_v35 = vmul.f32 %v1258_v30, %v2528_v42 }
 0x9b4   :  { %1289 = vmatmul.f32.gmra.mxu2 %v1262_v35  ;;  %1710 = vmatmul.msk.f32.gmra.mxu3 %vm408_vm10, %v1263_v34 }
 0xa2f   :  { %v1287_v58 = vpop.f32.mrf.mxu2  ;;  %v1310_v37 = vpop.f32.mrf.mxu3 }
 0xa30   :  { %v1311_v61 = vadd.f32 %v1310_v37, %v1287_v58 }
 0xa32   :  { %1716 = vmatmul.msk.f32.vlgmr.msra.gmra.mxu1 %vm92_vm0, %v1311_v61  ;;  %v1833_v61 = vmov 1.4142135  }
 0xa37   :  { %v1290_v5 = vpop.f32.mrf.mxu2  ;;  %v1313_v62 = vpop.f32.mrf.mxu3 }
 0xa38   :  { %v1314_v42 = vadd.f32 %v1313_v62, %v1290_v5 }
 0xa3a   :  { %1717 = vmatmul.msk.f32.gmra.mxu1 %vm92_vm0, %v1314_v42 }
 0xaaf   :  { %v1357_v43 = vpop.f32.mrf.mxu1 }
 0xab0   :  { %v1358_v45 = vadd.f32 %v1357_v43, %v1332_v40  ;;  %v1748_v40 = vld [vmem:[%s2829_s29] ss:$0 sm:$0xff] }
 0xab2   :  { %v1364_v47 = vmul.f32 %v1363_v41, %v1358_v45 }
 0xab4   :  { %v2672_v49 = vadd.f32 %v1364_v47, %v2204_v3 }
 0xab6   :  { %v1368_v51 = vsel %vm92_vm0, %v2672_v49, 0.0 }
 0xab7   :  { %v1360_v52 = vpop.f32.mrf.mxu1  ;;  %1369 = vadd.xlane.f32.xlu2 %v1368_v51 }
 0xab8   :  { %v1361_v53 = vadd.f32 %v1360_v52, %v1333_v50  ;;  %v1557_v52 = vld [vmem:[%s2781_s12 + $0x38] sm:$0xff] }
 0xab9   :  { %1576 = vmatpush.msrb.mxu2 %v1557_v52 }
 0xaba   :  { %v1365_v44 = vmul.f32 %v1363_v41, %v1361_v53 }
 0xabc   :  { %v2677_v54 = vadd.f32 %v1365_v44, %v2209_v8 }
 0xabe   :  { %v1371_v59 = vsel %vm92_vm0, %v2677_v54, 0.0 }
 0xabf   :  { %1372 = vadd.xlane.f32.xlu1 %v1371_v59 }
 0xb2a   :  { %v1370_v55 = vpop.xlane.xlu2 %1369 }
 0xb2b   :  { %v1374_v56 = vmul.f32 %v1370_v55, %v1991_v10  ;;  %v1556_v55 = vld [vmem:[%s2781_s12 + $0x30] sm:$0xff] }
 0xb2c   :  { %1577 = vmatpush.msrb.mxu2 %v1556_v55 }
 0xb2d   :  { %v1376_v3 = vsub.f32 %v2672_v49, %v1374_v56 }
 0xb2f   :  { %v1378_v57 = vmul.f32 %v1376_v3, %v1376_v3 }
 0xb31   :  { %v1380_v36 = vsel %vm92_vm0, %v1378_v57, 0.0 }
 0xb32   :  { %1381 = vadd.xlane.f32.xlu0 %v1380_v36  ;;  %v1373_v1 = vpop.xlane.xlu1 %1372  ;;  %v1555_v36 = vld [vmem:[%s2781_s12 + $0x28] sm:$0xff] }
 0xb33   :  { %v1375_v33 = vmul.f32 %v1373_v1, %v1991_v10  ;;  %1578 = vmatpush.msrb.mxu2 %v1555_v36 }
 0xb35   :  { %v1377_v31 = vsub.f32 %v2677_v54, %v1375_v33 }
 0xb37   :  { %v1379_v8 = vmul.f32 %v1377_v31, %v1377_v31 }
 0xb39   :  { %v1383_v4 = vsel %vm92_vm0, %v1379_v8, 0.0  ;;  %v1554_v8 = vld [vmem:[%s2781_s12 + $0x20] sm:$0xff] }
 0xb3a   :  { %1384 = vadd.xlane.f32.xlu2 %v1383_v4  ;;  %1579 = vmatpush.msrb.mxu2 %v1554_v8 }
 0xb3c   :  { %1580 = vmatpush.msrb.mxu2 %v1553_v7 }
 0xba5   :  { %v1382_v11 = vpop.xlane.xlu0 %1381 }
 0xba6   :  { %v1386_v12 = vmul.f32 %v1382_v11, %v1991_v10 }
 0xba8   :  { %v1388_v13 = vadd.f32 1e-05, %v1386_v12 }
 0xbaa   :  { %1788 = vrsqrt.f32 %v1388_v13  ;;  %vm1396_vm11 = vweird.f32 %v1388_v13 }
 0xbad   :  { %v1385_v0 = vpop.xlane.xlu2 %1384 }
 0xbae   :  { %v1387_v16 = vmul.f32 %v1385_v0, %v1991_v10 }
 0xbb0   :  { %v1789_v18 = vpop.eup %1788  ;;  %v1389_v19 = vadd.f32 1e-05, %v1387_v16 }
 0xbb1   :  { %v1391_v20 = vmul.f32 %v1789_v18, %v1388_v13  ;;  %vm1397_vm9 = vweird.f32 %v1789_v18  ;;  %v1552_v13 = vld [vmem:[%s2781_s12 + $0x10] sm:$0xff] }
 0xbb2   :  { %1790 = vrsqrt.f32 %v1389_v19  ;;  %vm1398_vm4 = vmor %vm1396_vm11, %vm1397_vm9  ;;  %vm1406_vm6 = vweird.f32 %v1389_v19  ;;  %1581 = vmatpush.msrb.mxu2 %v1552_v13 }
 0xbb3   :  { %v1392_v21 = vmul.f32 %v1789_v18, %v1391_v20  ;;  %1792 = vrcp.f32 %v1833_v61  ;;  %v1551_v20 = vld [vmem:[%s2781_s12 + $0x8] sm:$0xff] }
 0xbb4   :  { %1582 = vmatpush.msrb.mxu2 %v1551_v20 }
 0xbb5   :  { %v1393_v22 = vmul.f32 0.5, %v1392_v21 }
 0xbb7   :  { %v1394_v23 = vsub.f32 1.5, %v1393_v22 }
 0xbb8   :  { %v1791_v15 = vpop.eup %1790 }
 0xbb9   :  { %v1395_v2 = vmul.f32 %v1789_v18, %v1394_v23  ;;  %v1401_v24 = vmul.f32 %v1791_v15, %v1389_v19  ;;  %vm1407_vm5 = vweird.f32 %v1791_v15  ;;  %v1793_v5 = vpop.eup %1792 }
 0xbba   :  { %vm1408_vm7 = vmor %vm1406_vm6, %vm1407_vm5  ;;  %v1458_v62 = vmul.f32 1.4142135, %v1793_v5  ;;  %vm1462_vm12 = vweird.f32 %v1793_v5 }
 0xbbb   :  { %v1399_v14 = vsel %vm1398_vm4, %v1789_v18, %v1395_v2  ;;  %v1402_v10 = vmul.f32 %v1791_v15, %v1401_v24 }
 0xbbc   :  { %v1410_v29 = vmul.f32 %v1399_v14, %v1376_v3  ;;  %v1459_v42 = vsub.f32 1.0, %v1458_v62 }
 0xbbd   :  { %v1403_v63 = vmul.f32 0.5, %v1402_v10 }
 0xbbe   :  { %v1413_v30 = vmul.f32 %v1412_v26, %v1410_v29  ;;  %v1460_v38 = vmul.f32 %v1793_v5, %v1459_v42 }
 0xbbf   :  { %v1404_v32 = vsub.f32 1.5, %v1403_v63 }
 0xbc0   :  { %v1416_v34 = vadd.f32 %v1415_v28, %v1413_v30  ;;  %v1461_v27 = vadd.f32 %v1793_v5, %v1460_v38 }
 0xbc1   :  { %v1405_v35 = vmul.f32 %v1791_v15, %v1404_v32 }
 0xbc2   :  { %1718 = vmatmul.msk.f32.vlgmr.msrb.gmra.mxu0 %vm92_vm0, %v1416_v34  ;;  %v1463_v43 = vsel %vm1462_vm12, %v1793_v5, %v1461_v27 }
 0xbc3   :  { %v1409_v60 = vsel %vm1408_vm7, %v1791_v15, %v1405_v35  ;;  %v1550_v15 = vld [vmem:[%s2781_s12] sm:$0xff] }
 0xbc4   :  { %v1411_v39 = vmul.f32 %v1409_v60, %v1377_v31  ;;  %1583 = vmatpush.msrb.mxu2 %v1550_v15 }
 0xbc6   :  { %v1414_v58 = vmul.f32 %v1412_v26, %v1411_v39 }
 0xbc8   :  { %v1417_v37 = vadd.f32 %v1415_v28, %v1414_v58 }
 0xbca   :  { %1719 = vmatmul.msk.f32.gmra.mxu0 %vm92_vm0, %v1417_v37 }
 0xc3f   :  { %v1449_v41 = vpop.f32.mrf.mxu0 }
 0xc40   :  { %v2712_v45 = vadd.f32 %v1748_v40, %v1449_v41 }
 0xc42   :  { %v2715_v47 = vmul.f32 %v1463_v43, %v2712_v45 }
 0xc44   :  { %v1466_v48 = vmul.f32 %v2715_v47, %v2715_v47 }
 0xc46   :  { %v1467_v50 = vmin.f32 %v1466_v48, 16.0 }
 0xc47   :  { %v1452_v51 = vpop.f32.mrf.mxu0 }
 0xc48   :  { %v1468_v53 = vmul.f32 2.1237322e-06, %v1467_v50  ;;  %v1479_v44 = vmul.f32 3.8918573e-05, %v1467_v50  ;;  %v2722_v59 = vadd.f32 %v1748_v40, %v1452_v51 }
 0xc4a   :  { %v1469_v56 = vadd.f32 0.00028619796, %v1468_v53  ;;  %v1480_v3 = vadd.f32 0.001143296, %v1479_v44  ;;  %v2728_v57 = vmul.f32 %v1463_v43, %v2722_v59 }
 0xc4c   :  { %v1470_v1 = vmul.f32 %v1469_v56, %v1467_v50  ;;  %v1481_v33 = vmul.f32 %v1480_v3, %v1467_v50  ;;  %v1506_v31 = vmul.f32 %v2728_v57, %v2728_v57 }
 0xc4e   :  { %v1482_v4 = vadd.f32 0.014752088, %v1481_v33  ;;  %v1507_v46 = vmin.f32 %v1506_v31, 16.0  ;;  %v1471_v6 = vadd.f32 0.0036580483, %v1470_v1 }
 0xc50   :  { %v1483_v9 = vmul.f32 %v1482_v4, %v1467_v50  ;;  %v1508_v11 = vmul.f32 2.1237322e-06, %v1507_v46  ;;  %v1519_v12 = vmul.f32 3.8918573e-05, %v1507_v46  ;;  %v1472_v18 = vmul.f32 %v1471_v6, %v1467_v50 }
 0xc51   :  { %v1455_v4 = vmul.f32 0.5, %v2712_v45  ;;  %v1749_v45 = vld [vmem:[%s2782_s13] ss:$0 sm:$0xff]  ;;  %s1604_s13 = sshll.u32 %s2796_s27, 4  ;;  %s1605_s13 = int_to_ptr.hbm [resolvable:$true] %s1604_s13 }
 0xc52   :  { %v1484_v0 = vadd.f32 0.112945676, %v1483_v9  ;;  %v1509_v16 = vadd.f32 0.00028619796, %v1508_v11  ;;  %v1520_v19 = vadd.f32 0.001143296, %v1519_v12 }
 0xc53   :  { %v1473_v24 = vadd.f32 0.05243302, %v1472_v18 }
 0xc54   :  { %v1485_v21 = vmul.f32 %v1484_v0, %v1467_v50  ;;  %v1510_v22 = vmul.f32 %v1509_v16, %v1507_v46  ;;  %v1521_v23 = vmul.f32 %v1520_v19, %v1507_v46  ;;  %v1456_v16 = vmul.f32 0.5, %v2722_v59 }
 0xc55   :  { %v1474_v28 = vmul.f32 %v1473_v24, %v1467_v50 }
 0xc56   :  { %v1486_v2 = vadd.f32 0.4994258, %v1485_v21  ;;  %v1522_v25 = vadd.f32 0.014752088, %v1521_v23  ;;  %v1511_v14 = vadd.f32 0.0036580483, %v1510_v22 }
 0xc57   :  { %v1475_v32 = vadd.f32 0.18741608, %v1474_v28 }
 0xc58   :  { %v1487_v26 = vmul.f32 %v1486_v2, %v1467_v50  ;;  %v1523_v10 = vmul.f32 %v1522_v25, %v1507_v46  ;;  %v1512_v63 = vmul.f32 %v1511_v14, %v1507_v46 }
 0xc59   :  { %v1476_v58 = vmul.f32 %v1475_v32, %v1467_v50 }
 0xc5a   :  { %v1488_v17 = vadd.f32 1.0, %v1487_v26  ;;  %v1524_v29 = vadd.f32 0.112945676, %v1523_v10  ;;  %v1513_v35 = vadd.f32 0.05243302, %v1512_v63 }
 0xc5b   :  { %v1477_v38 = vadd.f32 1.1283791, %v1476_v58 }
 0xc5c   :  { %1794 = vrcp.f32 %v1488_v17  ;;  %v1525_v30 = vmul.f32 %v1524_v29, %v1507_v46  ;;  %v1514_v5 = vmul.f32 %v1513_v35, %v1507_v46  ;;  %v1500_v42 = vand.u32 2147483648, %v1488_v17 }
 0xc5d   :  { %v1498_v40 = vand.u32 2147483647, %v1488_v17  ;;  %vm1494_vm14 = vweird.f32 %v1488_v17  ;;  %v1478_v52 = vmul.f32 %v1477_v38, %v2715_v47 }
 0xc5e   :  { %v1526_v34 = vadd.f32 0.4994258, %v1525_v30  ;;  %v1515_v41 = vadd.f32 0.18741608, %v1514_v5  ;;  %v1501_v48 = vor.u32 1.1754944e-38, %v1500_v42 }
 0xc5f   :  { %vm1499_vm1 = vcmp.eq.f32.partialorder %v1498_v40, 8.507059e+37 }
 0xc60   :  { %v1527_v60 = vmul.f32 %v1526_v34, %v1507_v46  ;;  %v1516_v44 = vmul.f32 %v1515_v41, %v1507_v46 }
 0xc62   :  { %v1795_v39 = vpop.eup %1794  ;;  %v1528_v61 = vadd.f32 1.0, %v1527_v60  ;;  %v1517_v33 = vadd.f32 1.1283791, %v1516_v44 }
 0xc63   :  { %v1490_v37 = vmul.f32 %v1795_v39, %v1488_v17  ;;  %vm1495_vm13 = vweird.f32 %v1795_v39 }
 0xc64   :  { %1796 = vrcp.f32 %v1528_v61  ;;  %vm1496_vm15 = vmor %vm1494_vm14, %vm1495_vm13  ;;  %v1540_v1 = vand.u32 2147483648, %v1528_v61  ;;  %v1538_v8 = vand.u32 2147483647, %v1528_v61  ;;  %vm1534_vm3 = vweird.f32 %v1528_v61 }
 0xc65   :  { %v1491_v62 = vsub.f32 1.0, %v1490_v37  ;;  %v1518_v11 = vmul.f32 %v1517_v33, %v2728_v57  ;;  %v1800_v57 = vld [vmem:[%s2785_s16] sm:$0x7]  ;;  %s1835_s16 = smov 128  }
 0xc66   :  { %v1541_v47 = vor.u32 1.1754944e-38, %v1540_v1  ;;  %vm1539_vm9 = vcmp.eq.f32.partialorder %v1538_v8, 8.507059e+37  ;;  %v1591_v20 = vperm.slane %v1800_v57, 2 }
 0xc67   :  { %v1492_v27 = vmul.f32 %v1795_v39, %v1491_v62 }
 0xc69   :  { %v1493_v43 = vadd.f32 %v1795_v39, %v1492_v27 }
 0xc6a   :  { %v1797_v51 = vpop.eup %1796 }
 0xc6b   :  { %v1497_v53 = vsel %vm1496_vm15, %v1795_v39, %v1493_v43  ;;  %v1530_v55 = vmul.f32 %v1797_v51, %v1528_v61  ;;  %vm1535_vm2 = vweird.f32 %v1797_v51 }
 0xc6c   :  { %v1502_v50 = vsel %vm1499_vm1, %v1501_v48, %v1497_v53  ;;  %vm1536_vm8 = vmor %vm1534_vm3, %vm1535_vm2 }
 0xc6d   :  { %v1503_v56 = vmul.f32 %v1502_v50, %v1478_v52  ;;  %v1531_v3 = vsub.f32 1.0, %v1530_v55 }
 0xc6f   :  { %v1720_v36 = vclamps-f32 %v1503_v56, 1.0  ;;  %v1532_v31 = vmul.f32 %v1797_v51, %v1531_v3 }
 0xc71   :  { %v1546_v6 = vadd.f32 1.0, %v1720_v36  ;;  %v1533_v7 = vadd.f32 %v1797_v51, %v1532_v31 }
 0xc73   :  { %v1548_v9 = vmul.f32 %v1546_v6, %v1455_v4  ;;  %v1537_v46 = vsel %vm1536_vm8, %v1797_v51, %v1533_v7 }
 0xc74   :  { %v1542_v12 = vsel %vm1539_vm9, %v1541_v47, %v1537_v46 }
 0xc75   :  { %1722 = vmatmul.msk.f32.vlgmr.msrb.gmra.mxu2 %vm408_vm10, %v1548_v9  ;;  %v1543_v13 = vmul.f32 %v1542_v12, %v1518_v11 }
 0xc77   :  { %v1721_v0 = vclamps-f32 %v1543_v13, 1.0 }
 0xc79   :  { %v1547_v18 = vadd.f32 1.0, %v1721_v0 }
 0xc7b   :  { %v1549_v19 = vmul.f32 %v1547_v18, %v1456_v16 }
 0xc7d   :  { %1723 = vmatmul.msk.f32.gmra.mxu2 %vm408_vm10, %v1549_v19 }
 0xcf8   :  { %v1585_v21 = vpop.f32.mrf.mxu2 }
 0xcf9   :  { %v1586_v22 = vadd.f32 %v1749_v45, %v1585_v21 }
 0xcfb   :  { %v1592_v23 = vmul.f32 %v1591_v20, %v1586_v22 }
 0xcfd   :  { %v1594_v15 = vadd.f32 %v1592_v23, %v2672_v49 }
 0xcff   :  { %1596 = vst.msk [vmem:[#allocation2] sm:$0xff] %vm92_vm0, %v1594_v15 }
 0xd00   :  { %v1588_v59 = vpop.f32.mrf.mxu2 }
 0xd01   :  { %v1589_v2 = vadd.f32 %v1749_v45, %v1588_v59 }
 0xd03   :  { %v1593_v24 = vmul.f32 %v1591_v20, %v1589_v2 }
 0xd05   :  { %v1595_v25 = vadd.f32 %v1593_v24, %v2677_v54 }
 0xd07   :  { %1597 = vst.msk [vmem:[#allocation2 + $0x8] sm:$0xff] %vm92_vm0, %v1595_v25 }
 0xd08   :  { %1610 = dma.vmem_to_hbm [thread:$0]  %s1603_s28, 256, %s1605_s13, [#allocation3], %s1835_s16, %s1835_s16, %s1836_s23  }
 0xd09   :  { %1825 = dma.done.wait [#allocation3], 256  }
 0xd0a   :  { %1826 = vsyncadd [#allocation3], 4294967040 }
 0xd0b   :  { %1615 = vsyncpa [#allocation3], 1 }

</bundles_post_ra>
